<compile_context>
chip_gen: v7x
topology: tpu7x:2x2x1
jax: 0.10.0
libtpu: 0.0.40
codegen_flags: <defaults>
</compile_context>

<pallas_src>
import jax
import jax.numpy as jnp
from jax.experimental import pallas as pl
from jax.experimental.pallas import tpu as pltpu

KH, KW = 5, 5
SH, SW = 2, 2
PH, PW = 2, 2


def _make_kernel(C_in, C_out, L, Wh):
    def kernel(x_ref, w_ref, b_ref, o_ref, acc_ref):
        # x_ref:   (1, 4, C_in, L)    4 stride-2 phase images, lanes = (t, i, j)
        # w_ref:   (KH*KW, C_out, C_in)
        # b_ref:   (C_out, 1)
        # o_ref:   (1, C_out, L)
        # acc_ref: VMEM scratch (C_out, L) float32
        acc_ref[...] = jnp.zeros_like(acc_ref)
        # Hoist the 4 phase-image loads out of the 25-tap loop.
        phases = [x_ref[0, p] for p in range(4)]
        for kh in range(KH):
            for kw in range(KW):
                p = (kh % 2) * 2 + (kw % 2)        # which phase image
                r = (kh // 2) * Wh + (kw // 2)     # static lane offset of tap
                wt = w_ref[kh * KW + kw]           # (C_out, C_in)
                contrib = jnp.dot(wt, phases[p],
                                  preferred_element_type=jnp.float32)
                # Output position d accumulates contrib[d + r]; the tail
                # [L - r, L) of acc is phase-grid garbage, cropped in wrapper.
                acc_ref[:, :L - r] = acc_ref[:, :L - r] + contrib[:, r:]
        out = acc_ref[...] + b_ref[...].astype(jnp.float32)
        o_ref[0] = jnp.maximum(out, 0.0).astype(o_ref.dtype)

    return kernel


def init_block_forward(x, weight, bias, *, compute_dtype=None):
    """InitBlock forward pass.

    x:      (B, T, C_in, H, W)       (PyTorch input layout)
    weight: (C_out, C_in, 1, 5, 5)   (PyTorch Conv3d weight)
    bias:   (C_out,)
    returns (B, C_out, T, H_out, W_out)
    """
    B, T, C_in, H, W = x.shape
    C_out = weight.shape[0]
    H_out = (H + 2 * PH - KH) // SH + 1
    W_out = (W + 2 * PW - KW) // SW + 1
    Hh, Wh = H_out + 2, W_out + 2          # per-phase spatial extents
    L = T * Hh * Wh

    if compute_dtype is None:
        compute_dtype = x.dtype            # use jnp.bfloat16 on v6e/v7x to halve HBM bytes

    # ---- wrapper glue: one O(input)-sized data-movement pass ----------------
    # (B,T,C,H,W) -> (B,C,T,H,W), replicate-pad spatial dims, then pad up to
    # (2*Hh, 2*Wh) so the 2x2 phase split is exact (extra rows/cols never read
    # by any valid tap).
    xf = jnp.transpose(x, (0, 2, 1, 3, 4))
    x_pad = jnp.pad(xf, ((0, 0), (0, 0), (0, 0), (PH, PH), (PW, PW)),
                    mode="edge")
    eh = 2 * Hh - (H + 2 * PH)
    ew = 2 * Wh - (W + 2 * PW)
    if eh or ew:
        x_pad = jnp.pad(x_pad, ((0, 0), (0, 0), (0, 0), (0, eh), (0, ew)),
                        mode="edge")
    # Phase split: xph[b, 2*ph+pw, ci, t*Hh*Wh + i*Wh + j] = x_pad[b, ci, t, 2i+ph, 2j+pw]
    xr = x_pad.reshape(B, C_in, T, Hh, 2, Wh, 2)
    xph = jnp.transpose(xr, (0, 4, 6, 1, 2, 3, 5)).reshape(B, 4, C_in, L)
    xph = xph.astype(compute_dtype)

    # Per-tap weights (KH*KW, C_out, C_in) and bias (C_out, 1).
    w_taps = jnp.transpose(weight[:, :, 0, :, :], (2, 3, 0, 1)).reshape(
        KH * KW, C_out, C_in).astype(compute_dtype)
    b2 = bias.reshape(C_out, 1).astype(jnp.float32)

    kernel = _make_kernel(C_in, C_out, L, Wh)
    out = pl.pallas_call(
        kernel,
        out_shape=jax.ShapeDtypeStruct((B, C_out, L), x.dtype),
        grid_spec=pltpu.PrefetchScalarGridSpec(
            num_scalar_prefetch=0,
            grid=(B,),
            in_specs=[
                pl.BlockSpec((1, 4, C_in, L), lambda b: (b, 0, 0, 0)),
                pl.BlockSpec((KH * KW, C_out, C_in), lambda b: (0, 0, 0)),
                pl.BlockSpec((C_out, 1), lambda b: (0, 0)),
            ],
            out_specs=pl.BlockSpec((1, C_out, L), lambda b: (b, 0, 0)),
            scratch_shapes=[pltpu.VMEM((C_out, L), jnp.float32)],
        ),
        compiler_params=pltpu.CompilerParams(
            dimension_semantics=("parallel",)),
    )(xph, w_taps, b2)

    # Already in (B, C_out, T, ...) order: just crop the phase-grid garbage.
    # (For production-scale T/H/W, add a grid axis tiling T to bound VMEM.)
    return out.reshape(B, C_out, T, Hh, Wh)[:, :, :, :H_out, :W_out]


def _reference(x, weight, bias):
    """Pure-JAX reference (lax conv) for correctness checking."""
    B, T, C_in, H, W = x.shape
    C_out = weight.shape[0]
    x_f = jnp.transpose(x, (0, 1, 3, 4, 2)).reshape(B * T, H, W, C_in)
    x_pad = jnp.pad(x_f, ((0, 0), (2, 2), (2, 2), (0, 0)), mode="edge")
    w = jnp.transpose(weight[:, :, 0, :, :], (2, 3, 1, 0))  # HWIO
    y = jax.lax.conv_general_dilated(
        x_pad, w, window_strides=(2, 2), padding="VALID",
        dimension_numbers=("NHWC", "HWIO", "NHWC"))
    y = jnp.maximum(y + bias, 0.0)
    H_out, W_out = y.shape[1], y.shape[2]
    y = y.reshape(B, T, H_out, W_out, C_out)
    return jnp.transpose(y, (0, 4, 1, 2, 3))


if __name__ == "__main__":
    key = jax.random.PRNGKey(0)
    B, T, C_in, H, W = 2, 3, 4, 16, 16
    C_out = 8

    k1, k2, k3 = jax.random.split(key, 3)
    x = jax.random.normal(k1, (B, T, C_in, H, W), dtype=jnp.float32)

    # Deterministic init mimicking nn.Conv3d defaults:
    # kaiming_uniform(a=sqrt(5)) -> U(-1/sqrt(fan_in), 1/sqrt(fan_in))
    fan_in = C_in * 1 * KH * KW
    bound = 1.0 / (fan_in ** 0.5)
    weight = jax.random.uniform(
        k2, (C_out, C_in, 1, KH, KW), jnp.float32, -bound, bound)
    bias = jax.random.uniform(k3, (C_out,), jnp.float32, -bound, bound)

    fwd = jax.jit(init_block_forward)
    out = jax.block_until_ready(fwd(x, weight, bias))
    ref = jax.block_until_ready(_reference(x, weight, bias))

    assert out.shape == (B, C_out, T, 8, 8), out.shape
    max_err = float(jnp.max(jnp.abs(out - ref)))
    assert jnp.allclose(out, ref, atol=1e-3, rtol=1e-3), max_err
    print("KERNEL_OK")
</pallas_src>

<mosaic_0001>
module attributes {stable_mosaic.version = 11 : i64} {
  func.func @kernel(%arg0: i32, %arg1: memref<1x4x4x300xf32, #tpu.memory_space<vmem>>, %arg2: memref<25x8x4xf32, #tpu.memory_space<vmem>>, %arg3: memref<8x1xf32, #tpu.memory_space<vmem>>, %arg4: memref<1x8x300xf32, #tpu.memory_space<vmem>>, %arg5: memref<8x300xf32, #tpu.memory_space<vmem>>) attributes {dimension_semantics = [#tpu.dimension_semantics<parallel>], iteration_bounds = array<i64: 2>, scalar_prefetch = 0 : i64, scratch_operands = 1 : i64, tpu.core_type = #tpu.core_type<tc>, window_params = [{transform_indices = @transform_0, window_bounds = array<i64: 1, 4, 4, 300>}, {pipeline_mode = #tpu.pipeline_mode<synchronous>, transform_indices = @transform_1, window_bounds = array<i64: 25, 8, 4>}, {pipeline_mode = #tpu.pipeline_mode<synchronous>, transform_indices = @transform_2, window_bounds = array<i64: 8, 1>}, {transform_indices = @transform_3, window_bounds = array<i64: 1, 8, 300>}]} {
    %cst = arith.constant 0.000000e+00 : f32
    %0 = vector.broadcast %cst : f32 to vector<8x300xf32>
    %c0 = arith.constant 0 : index
    %c0_0 = arith.constant 0 : index
    %1 = vector.load %arg5[%c0, %c0_0] : memref<8x300xf32, #tpu.memory_space<vmem>>, vector<8x300xf32>
    tpu.vector_store %arg5[%c0, %c0_0], %0 {strides = array<i32>} : memref<8x300xf32, #tpu.memory_space<vmem>>, vector<8x300xf32>,
    %c0_1 = arith.constant 0 : index
    %c0_2 = arith.constant 0 : index
    %c0_3 = arith.constant 0 : index
    %c0_4 = arith.constant 0 : index
    %2 = vector.load %arg1[%c0_1, %c0_2, %c0_3, %c0_4] : memref<1x4x4x300xf32, #tpu.memory_space<vmem>>, vector<1x1x4x300xf32>
    %3 = vector.shape_cast %2 : vector<1x1x4x300xf32> to vector<4x300xf32>
    %c0_5 = arith.constant 0 : index
    %c1 = arith.constant 1 : index
    %c0_6 = arith.constant 0 : index
    %c0_7 = arith.constant 0 : index
    %4 = vector.load %arg1[%c0_5, %c1, %c0_6, %c0_7] : memref<1x4x4x300xf32, #tpu.memory_space<vmem>>, vector<1x1x4x300xf32>
    %5 = vector.shape_cast %4 : vector<1x1x4x300xf32> to vector<4x300xf32>
    %c0_8 = arith.constant 0 : index
    %c2 = arith.constant 2 : index
    %c0_9 = arith.constant 0 : index
    %c0_10 = arith.constant 0 : index
    %6 = vector.load %arg1[%c0_8, %c2, %c0_9, %c0_10] : memref<1x4x4x300xf32, #tpu.memory_space<vmem>>, vector<1x1x4x300xf32>
    %7 = vector.shape_cast %6 : vector<1x1x4x300xf32> to vector<4x300xf32>
    %c0_11 = arith.constant 0 : index
    %c3 = arith.constant 3 : index
    %c0_12 = arith.constant 0 : index
    %c0_13 = arith.constant 0 : index
    %8 = vector.load %arg1[%c0_11, %c3, %c0_12, %c0_13] : memref<1x4x4x300xf32, #tpu.memory_space<vmem>>, vector<1x1x4x300xf32>
    %9 = vector.shape_cast %8 : vector<1x1x4x300xf32> to vector<4x300xf32>
    %c0_14 = arith.constant 0 : index
    %c0_15 = arith.constant 0 : index
    %c0_16 = arith.constant 0 : index
    %10 = vector.load %arg2[%c0_14, %c0_15, %c0_16] : memref<25x8x4xf32, #tpu.memory_space<vmem>>, vector<1x8x4xf32>
    %11 = vector.shape_cast %10 : vector<1x8x4xf32> to vector<8x4xf32>
    %cst_17 = arith.constant dense<0.000000e+00> : vector<8x300xf32>
    %12 = tpu.matmul %11, %3, %cst_17 {dimension_numbers = #tpu.dot_dimension_numbers<[1], [0], [0], [1], [0, 0, 1, 1], [], []>} : vector<8x4xf32>, vector<4x300xf32>, vector<8x300xf32> -> vector<8x300xf32>
    %c0_18 = arith.constant 0 : index
    %c0_19 = arith.constant 0 : index
    %13 = vector.load %arg5[%c0_18, %c0_19] : memref<8x300xf32, #tpu.memory_space<vmem>>, vector<8x300xf32>
    %14 = arith.addf %13, %12 : vector<8x300xf32>
    %c0_20 = arith.constant 0 : index
    %c0_21 = arith.constant 0 : index
    %15 = vector.load %arg5[%c0_20, %c0_21] : memref<8x300xf32, #tpu.memory_space<vmem>>, vector<8x300xf32>
    tpu.vector_store %arg5[%c0_20, %c0_21], %14 {strides = array<i32>} : memref<8x300xf32, #tpu.memory_space<vmem>>, vector<8x300xf32>,
    %c1_22 = arith.constant 1 : index
    %c0_23 = arith.constant 0 : index
    %c0_24 = arith.constant 0 : index
    %16 = vector.load %arg2[%c1_22, %c0_23, %c0_24] : memref<25x8x4xf32, #tpu.memory_space<vmem>>, vector<1x8x4xf32>
    %17 = vector.shape_cast %16 : vector<1x8x4xf32> to vector<8x4xf32>
    %cst_25 = arith.constant dense<0.000000e+00> : vector<8x300xf32>
    %18 = tpu.matmul %17, %5, %cst_25 {dimension_numbers = #tpu.dot_dimension_numbers<[1], [0], [0], [1], [0, 0, 1, 1], [], []>} : vector<8x4xf32>, vector<4x300xf32>, vector<8x300xf32> -> vector<8x300xf32>
    %c0_26 = arith.constant 0 : index
    %c0_27 = arith.constant 0 : index
    %19 = vector.load %arg5[%c0_26, %c0_27] : memref<8x300xf32, #tpu.memory_space<vmem>>, vector<8x300xf32>
    %20 = arith.addf %19, %18 : vector<8x300xf32>
    %c0_28 = arith.constant 0 : index
    %c0_29 = arith.constant 0 : index
    %21 = vector.load %arg5[%c0_28, %c0_29] : memref<8x300xf32, #tpu.memory_space<vmem>>, vector<8x300xf32>
    tpu.vector_store %arg5[%c0_28, %c0_29], %20 {strides = array<i32>} : memref<8x300xf32, #tpu.memory_space<vmem>>, vector<8x300xf32>,
    %c2_30 = arith.constant 2 : index
    %c0_31 = arith.constant 0 : index
    %c0_32 = arith.constant 0 : index
    %22 = vector.load %arg2[%c2_30, %c0_31, %c0_32] : memref<25x8x4xf32, #tpu.memory_space<vmem>>, vector<1x8x4xf32>
    %23 = vector.shape_cast %22 : vector<1x8x4xf32> to vector<8x4xf32>
    %cst_33 = arith.constant dense<0.000000e+00> : vector<8x300xf32>
    %24 = tpu.matmul %23, %3, %cst_33 {dimension_numbers = #tpu.dot_dimension_numbers<[1], [0], [0], [1], [0, 0, 1, 1], [], []>} : vector<8x4xf32>, vector<4x300xf32>, vector<8x300xf32> -> vector<8x300xf32>
    %c0_34 = arith.constant 0 : index
    %c0_35 = arith.constant 0 : index
    %25 = vector.load %arg5[%c0_34, %c0_35] : memref<8x300xf32, #tpu.memory_space<vmem>>, vector<8x299xf32>
    %26 = vector.extract_strided_slice %24 {offsets = [0, 1], sizes = [8, 299], strides = [1, 1]} : vector<8x300xf32> to vector<8x299xf32>
    %27 = arith.addf %25, %26 : vector<8x299xf32>
    %c0_36 = arith.constant 0 : index
    %c0_37 = arith.constant 0 : index
    %28 = vector.load %arg5[%c0_36, %c0_37] : memref<8x300xf32, #tpu.memory_space<vmem>>, vector<8x299xf32>
    tpu.vector_store %arg5[%c0_36, %c0_37], %27 {strides = array<i32>} : memref<8x300xf32, #tpu.memory_space<vmem>>, vector<8x299xf32>,
    %c3_38 = arith.constant 3 : index
    %c0_39 = arith.constant 0 : index
    %c0_40 = arith.constant 0 : index
    %29 = vector.load %arg2[%c3_38, %c0_39, %c0_40] : memref<25x8x4xf32, #tpu.memory_space<vmem>>, vector<1x8x4xf32>
    %30 = vector.shape_cast %29 : vector<1x8x4xf32> to vector<8x4xf32>
    %cst_41 = arith.constant dense<0.000000e+00> : vector<8x300xf32>
    %31 = tpu.matmul %30, %5, %cst_41 {dimension_numbers = #tpu.dot_dimension_numbers<[1], [0], [0], [1], [0, 0, 1, 1], [], []>} : vector<8x4xf32>, vector<4x300xf32>, vector<8x300xf32> -> vector<8x300xf32>
    %c0_42 = arith.constant 0 : index
    %c0_43 = arith.constant 0 : index
    %32 = vector.load %arg5[%c0_42, %c0_43] : memref<8x300xf32, #tpu.memory_space<vmem>>, vector<8x299xf32>
    %33 = vector.extract_strided_slice %31 {offsets = [0, 1], sizes = [8, 299], strides = [1, 1]} : vector<8x300xf32> to vector<8x299xf32>
    %34 = arith.addf %32, %33 : vector<8x299xf32>
    %c0_44 = arith.constant 0 : index
    %c0_45 = arith.constant 0 : index
    %35 = vector.load %arg5[%c0_44, %c0_45] : memref<8x300xf32, #tpu.memory_space<vmem>>, vector<8x299xf32>
    tpu.vector_store %arg5[%c0_44, %c0_45], %34 {strides = array<i32>} : memref<8x300xf32, #tpu.memory_space<vmem>>, vector<8x299xf32>,
    %c4 = arith.constant 4 : index
    %c0_46 = arith.constant 0 : index
    %c0_47 = arith.constant 0 : index
    %36 = vector.load %arg2[%c4, %c0_46, %c0_47] : memref<25x8x4xf32, #tpu.memory_space<vmem>>, vector<1x8x4xf32>
    %37 = vector.shape_cast %36 : vector<1x8x4xf32> to vector<8x4xf32>
    %cst_48 = arith.constant dense<0.000000e+00> : vector<8x300xf32>
    %38 = tpu.matmul %37, %3, %cst_48 {dimension_numbers = #tpu.dot_dimension_numbers<[1], [0], [0], [1], [0, 0, 1, 1], [], []>} : vector<8x4xf32>, vector<4x300xf32>, vector<8x300xf32> -> vector<8x300xf32>
    %c0_49 = arith.constant 0 : index
    %c0_50 = arith.constant 0 : index
    %39 = vector.load %arg5[%c0_49, %c0_50] : memref<8x300xf32, #tpu.memory_space<vmem>>, vector<8x298xf32>
    %40 = vector.extract_strided_slice %38 {offsets = [0, 2], sizes = [8, 298], strides = [1, 1]} : vector<8x300xf32> to vector<8x298xf32>
    %41 = arith.addf %39, %40 : vector<8x298xf32>
    %c0_51 = arith.constant 0 : index
    %c0_52 = arith.constant 0 : index
    %42 = vector.load %arg5[%c0_51, %c0_52] : memref<8x300xf32, #tpu.memory_space<vmem>>, vector<8x298xf32>
    tpu.vector_store %arg5[%c0_51, %c0_52], %41 {strides = array<i32>} : memref<8x300xf32, #tpu.memory_space<vmem>>, vector<8x298xf32>,
    %c5 = arith.constant 5 : index
    %c0_53 = arith.constant 0 : index
    %c0_54 = arith.constant 0 : index
    %43 = vector.load %arg2[%c5, %c0_53, %c0_54] : memref<25x8x4xf32, #tpu.memory_space<vmem>>, vector<1x8x4xf32>
    %44 = vector.shape_cast %43 : vector<1x8x4xf32> to vector<8x4xf32>
    %cst_55 = arith.constant dense<0.000000e+00> : vector<8x300xf32>
    %45 = tpu.matmul %44, %7, %cst_55 {dimension_numbers = #tpu.dot_dimension_numbers<[1], [0], [0], [1], [0, 0, 1, 1], [], []>} : vector<8x4xf32>, vector<4x300xf32>, vector<8x300xf32> -> vector<8x300xf32>
    %c0_56 = arith.constant 0 : index
    %c0_57 = arith.constant 0 : index
    %46 = vector.load %arg5[%c0_56, %c0_57] : memref<8x300xf32, #tpu.memory_space<vmem>>, vector<8x300xf32>
    %47 = arith.addf %46, %45 : vector<8x300xf32>
    %c0_58 = arith.constant 0 : index
    %c0_59 = arith.constant 0 : index
    %48 = vector.load %arg5[%c0_58, %c0_59] : memref<8x300xf32, #tpu.memory_space<vmem>>, vector<8x300xf32>
    tpu.vector_store %arg5[%c0_58, %c0_59], %47 {strides = array<i32>} : memref<8x300xf32, #tpu.memory_space<vmem>>, vector<8x300xf32>,
    %c6 = arith.constant 6 : index
    %c0_60 = arith.constant 0 : index
    %c0_61 = arith.constant 0 : index
    %49 = vector.load %arg2[%c6, %c0_60, %c0_61] : memref<25x8x4xf32, #tpu.memory_space<vmem>>, vector<1x8x4xf32>
    %50 = vector.shape_cast %49 : vector<1x8x4xf32> to vector<8x4xf32>
    %cst_62 = arith.constant dense<0.000000e+00> : vector<8x300xf32>
    %51 = tpu.matmul %50, %9, %cst_62 {dimension_numbers = #tpu.dot_dimension_numbers<[1], [0], [0], [1], [0, 0, 1, 1], [], []>} : vector<8x4xf32>, vector<4x300xf32>, vector<8x300xf32> -> vector<8x300xf32>
    %c0_63 = arith.constant 0 : index
    %c0_64 = arith.constant 0 : index
    %52 = vector.load %arg5[%c0_63, %c0_64] : memref<8x300xf32, #tpu.memory_space<vmem>>, vector<8x300xf32>
    %53 = arith.addf %52, %51 : vector<8x300xf32>
    %c0_65 = arith.constant 0 : index
    %c0_66 = arith.constant 0 : index
    %54 = vector.load %arg5[%c0_65, %c0_66] : memref<8x300xf32, #tpu.memory_space<vmem>>, vector<8x300xf32>
    tpu.vector_store %arg5[%c0_65, %c0_66], %53 {strides = array<i32>} : memref<8x300xf32, #tpu.memory_space<vmem>>, vector<8x300xf32>,
    %c7 = arith.constant 7 : index
    %c0_67 = arith.constant 0 : index
    %c0_68 = arith.constant 0 : index
    %55 = vector.load %arg2[%c7, %c0_67, %c0_68] : memref<25x8x4xf32, #tpu.memory_space<vmem>>, vector<1x8x4xf32>
    %56 = vector.shape_cast %55 : vector<1x8x4xf32> to vector<8x4xf32>
    %cst_69 = arith.constant dense<0.000000e+00> : vector<8x300xf32>
    %57 = tpu.matmul %56, %7, %cst_69 {dimension_numbers = #tpu.dot_dimension_numbers<[1], [0], [0], [1], [0, 0, 1, 1], [], []>} : vector<8x4xf32>, vector<4x300xf32>, vector<8x300xf32> -> vector<8x300xf32>
    %c0_70 = arith.constant 0 : index
    %c0_71 = arith.constant 0 : index
    %58 = vector.load %arg5[%c0_70, %c0_71] : memref<8x300xf32, #tpu.memory_space<vmem>>, vector<8x299xf32>
    %59 = vector.extract_strided_slice %57 {offsets = [0, 1], sizes = [8, 299], strides = [1, 1]} : vector<8x300xf32> to vector<8x299xf32>
    %60 = arith.addf %58, %59 : vector<8x299xf32>
    %c0_72 = arith.constant 0 : index
    %c0_73 = arith.constant 0 : index
    %61 = vector.load %arg5[%c0_72, %c0_73] : memref<8x300xf32, #tpu.memory_space<vmem>>, vector<8x299xf32>
    tpu.vector_store %arg5[%c0_72, %c0_73], %60 {strides = array<i32>} : memref<8x300xf32, #tpu.memory_space<vmem>>, vector<8x299xf32>,
    %c8 = arith.constant 8 : index
    %c0_74 = arith.constant 0 : index
    %c0_75 = arith.constant 0 : index
    %62 = vector.load %arg2[%c8, %c0_74, %c0_75] : memref<25x8x4xf32, #tpu.memory_space<vmem>>, vector<1x8x4xf32>
    %63 = vector.shape_cast %62 : vector<1x8x4xf32> to vector<8x4xf32>
    %cst_76 = arith.constant dense<0.000000e+00> : vector<8x300xf32>
    %64 = tpu.matmul %63, %9, %cst_76 {dimension_numbers = #tpu.dot_dimension_numbers<[1], [0], [0], [1], [0, 0, 1, 1], [], []>} : vector<8x4xf32>, vector<4x300xf32>, vector<8x300xf32> -> vector<8x300xf32>
    %c0_77 = arith.constant 0 : index
    %c0_78 = arith.constant 0 : index
    %65 = vector.load %arg5[%c0_77, %c0_78] : memref<8x300xf32, #tpu.memory_space<vmem>>, vector<8x299xf32>
    %66 = vector.extract_strided_slice %64 {offsets = [0, 1], sizes = [8, 299], strides = [1, 1]} : vector<8x300xf32> to vector<8x299xf32>
    %67 = arith.addf %65, %66 : vector<8x299xf32>
    %c0_79 = arith.constant 0 : index
    %c0_80 = arith.constant 0 : index
    %68 = vector.load %arg5[%c0_79, %c0_80] : memref<8x300xf32, #tpu.memory_space<vmem>>, vector<8x299xf32>
    tpu.vector_store %arg5[%c0_79, %c0_80], %67 {strides = array<i32>} : memref<8x300xf32, #tpu.memory_space<vmem>>, vector<8x299xf32>,
    %c9 = arith.constant 9 : index
    %c0_81 = arith.constant 0 : index
    %c0_82 = arith.constant 0 : index
    %69 = vector.load %arg2[%c9, %c0_81, %c0_82] : memref<25x8x4xf32, #tpu.memory_space<vmem>>, vector<1x8x4xf32>
    %70 = vector.shape_cast %69 : vector<1x8x4xf32> to vector<8x4xf32>
    %cst_83 = arith.constant dense<0.000000e+00> : vector<8x300xf32>
    %71 = tpu.matmul %70, %7, %cst_83 {dimension_numbers = #tpu.dot_dimension_numbers<[1], [0], [0], [1], [0, 0, 1, 1], [], []>} : vector<8x4xf32>, vector<4x300xf32>, vector<8x300xf32> -> vector<8x300xf32>
    %c0_84 = arith.constant 0 : index
    %c0_85 = arith.constant 0 : index
    %72 = vector.load %arg5[%c0_84, %c0_85] : memref<8x300xf32, #tpu.memory_space<vmem>>, vector<8x298xf32>
    %73 = vector.extract_strided_slice %71 {offsets = [0, 2], sizes = [8, 298], strides = [1, 1]} : vector<8x300xf32> to vector<8x298xf32>
    %74 = arith.addf %72, %73 : vector<8x298xf32>
    %c0_86 = arith.constant 0 : index
    %c0_87 = arith.constant 0 : index
    %75 = vector.load %arg5[%c0_86, %c0_87] : memref<8x300xf32, #tpu.memory_space<vmem>>, vector<8x298xf32>
    tpu.vector_store %arg5[%c0_86, %c0_87], %74 {strides = array<i32>} : memref<8x300xf32, #tpu.memory_space<vmem>>, vector<8x298xf32>,
    %c10 = arith.constant 10 : index
    %c0_88 = arith.constant 0 : index
    %c0_89 = arith.constant 0 : index
    %76 = vector.load %arg2[%c10, %c0_88, %c0_89] : memref<25x8x4xf32, #tpu.memory_space<vmem>>, vector<1x8x4xf32>
    %77 = vector.shape_cast %76 : vector<1x8x4xf32> to vector<8x4xf32>
    %cst_90 = arith.constant dense<0.000000e+00> : vector<8x300xf32>
    %78 = tpu.matmul %77, %3, %cst_90 {dimension_numbers = #tpu.dot_dimension_numbers<[1], [0], [0], [1], [0, 0, 1, 1], [], []>} : vector<8x4xf32>, vector<4x300xf32>, vector<8x300xf32> -> vector<8x300xf32>
    %c0_91 = arith.constant 0 : index
    %c0_92 = arith.constant 0 : index
    %79 = vector.load %arg5[%c0_91, %c0_92] : memref<8x300xf32, #tpu.memory_space<vmem>>, vector<8x290xf32>
    %80 = vector.extract_strided_slice %78 {offsets = [0, 10], sizes = [8, 290], strides = [1, 1]} : vector<8x300xf32> to vector<8x290xf32>
    %81 = arith.addf %79, %80 : vector<8x290xf32>
    %c0_93 = arith.constant 0 : index
    %c0_94 = arith.constant 0 : index
    %82 = vector.load %arg5[%c0_93, %c0_94] : memref<8x300xf32, #tpu.memory_space<vmem>>, vector<8x290xf32>
    tpu.vector_store %arg5[%c0_93, %c0_94], %81 {strides = array<i32>} : memref<8x300xf32, #tpu.memory_space<vmem>>, vector<8x290xf32>,
    %c11 = arith.constant 11 : index
    %c0_95 = arith.constant 0 : index
    %c0_96 = arith.constant 0 : index
    %83 = vector.load %arg2[%c11, %c0_95, %c0_96] : memref<25x8x4xf32, #tpu.memory_space<vmem>>, vector<1x8x4xf32>
    %84 = vector.shape_cast %83 : vector<1x8x4xf32> to vector<8x4xf32>
    %cst_97 = arith.constant dense<0.000000e+00> : vector<8x300xf32>
    %85 = tpu.matmul %84, %5, %cst_97 {dimension_numbers = #tpu.dot_dimension_numbers<[1], [0], [0], [1], [0, 0, 1, 1], [], []>} : vector<8x4xf32>, vector<4x300xf32>, vector<8x300xf32> -> vector<8x300xf32>
    %c0_98 = arith.constant 0 : index
    %c0_99 = arith.constant 0 : index
    %86 = vector.load %arg5[%c0_98, %c0_99] : memref<8x300xf32, #tpu.memory_space<vmem>>, vector<8x290xf32>
    %87 = vector.extract_strided_slice %85 {offsets = [0, 10], sizes = [8, 290], strides = [1, 1]} : vector<8x300xf32> to vector<8x290xf32>
    %88 = arith.addf %86, %87 : vector<8x290xf32>
    %c0_100 = arith.constant 0 : index
    %c0_101 = arith.constant 0 : index
    %89 = vector.load %arg5[%c0_100, %c0_101] : memref<8x300xf32, #tpu.memory_space<vmem>>, vector<8x290xf32>
    tpu.vector_store %arg5[%c0_100, %c0_101], %88 {strides = array<i32>} : memref<8x300xf32, #tpu.memory_space<vmem>>, vector<8x290xf32>,
    %c12 = arith.constant 12 : index
    %c0_102 = arith.constant 0 : index
    %c0_103 = arith.constant 0 : index
    %90 = vector.load %arg2[%c12, %c0_102, %c0_103] : memref<25x8x4xf32, #tpu.memory_space<vmem>>, vector<1x8x4xf32>
    %91 = vector.shape_cast %90 : vector<1x8x4xf32> to vector<8x4xf32>
    %cst_104 = arith.constant dense<0.000000e+00> : vector<8x300xf32>
    %92 = tpu.matmul %91, %3, %cst_104 {dimension_numbers = #tpu.dot_dimension_numbers<[1], [0], [0], [1], [0, 0, 1, 1], [], []>} : vector<8x4xf32>, vector<4x300xf32>, vector<8x300xf32> -> vector<8x300xf32>
    %c0_105 = arith.constant 0 : index
    %c0_106 = arith.constant 0 : index
    %93 = vector.load %arg5[%c0_105, %c0_106] : memref<8x300xf32, #tpu.memory_space<vmem>>, vector<8x289xf32>
    %94 = vector.extract_strided_slice %92 {offsets = [0, 11], sizes = [8, 289], strides = [1, 1]} : vector<8x300xf32> to vector<8x289xf32>
    %95 = arith.addf %93, %94 : vector<8x289xf32>
    %c0_107 = arith.constant 0 : index
    %c0_108 = arith.constant 0 : index
    %96 = vector.load %arg5[%c0_107, %c0_108] : memref<8x300xf32, #tpu.memory_space<vmem>>, vector<8x289xf32>
    tpu.vector_store %arg5[%c0_107, %c0_108], %95 {strides = array<i32>} : memref<8x300xf32, #tpu.memory_space<vmem>>, vector<8x289xf32>,
    %c13 = arith.constant 13 : index
    %c0_109 = arith.constant 0 : index
    %c0_110 = arith.constant 0 : index
    %97 = vector.load %arg2[%c13, %c0_109, %c0_110] : memref<25x8x4xf32, #tpu.memory_space<vmem>>, vector<1x8x4xf32>
    %98 = vector.shape_cast %97 : vector<1x8x4xf32> to vector<8x4xf32>
    %cst_111 = arith.constant dense<0.000000e+00> : vector<8x300xf32>
    %99 = tpu.matmul %98, %5, %cst_111 {dimension_numbers = #tpu.dot_dimension_numbers<[1], [0], [0], [1], [0, 0, 1, 1], [], []>} : vector<8x4xf32>, vector<4x300xf32>, vector<8x300xf32> -> vector<8x300xf32>
    %c0_112 = arith.constant 0 : index
    %c0_113 = arith.constant 0 : index
    %100 = vector.load %arg5[%c0_112, %c0_113] : memref<8x300xf32, #tpu.memory_space<vmem>>, vector<8x289xf32>
    %101 = vector.extract_strided_slice %99 {offsets = [0, 11], sizes = [8, 289], strides = [1, 1]} : vector<8x300xf32> to vector<8x289xf32>
    %102 = arith.addf %100, %101 : vector<8x289xf32>
    %c0_114 = arith.constant 0 : index
    %c0_115 = arith.constant 0 : index
    %103 = vector.load %arg5[%c0_114, %c0_115] : memref<8x300xf32, #tpu.memory_space<vmem>>, vector<8x289xf32>
    tpu.vector_store %arg5[%c0_114, %c0_115], %102 {strides = array<i32>} : memref<8x300xf32, #tpu.memory_space<vmem>>, vector<8x289xf32>,
    %c14 = arith.constant 14 : index
    %c0_116 = arith.constant 0 : index
    %c0_117 = arith.constant 0 : index
    %104 = vector.load %arg2[%c14, %c0_116, %c0_117] : memref<25x8x4xf32, #tpu.memory_space<vmem>>, vector<1x8x4xf32>
    %105 = vector.shape_cast %104 : vector<1x8x4xf32> to vector<8x4xf32>
    %cst_118 = arith.constant dense<0.000000e+00> : vector<8x300xf32>
    %106 = tpu.matmul %105, %3, %cst_118 {dimension_numbers = #tpu.dot_dimension_numbers<[1], [0], [0], [1], [0, 0, 1, 1], [], []>} : vector<8x4xf32>, vector<4x300xf32>, vector<8x300xf32> -> vector<8x300xf32>
    %c0_119 = arith.constant 0 : index
    %c0_120 = arith.constant 0 : index
    %107 = vector.load %arg5[%c0_119, %c0_120] : memref<8x300xf32, #tpu.memory_space<vmem>>, vector<8x288xf32>
    %108 = vector.extract_strided_slice %106 {offsets = [0, 12], sizes = [8, 288], strides = [1, 1]} : vector<8x300xf32> to vector<8x288xf32>
    %109 = arith.addf %107, %108 : vector<8x288xf32>
    %c0_121 = arith.constant 0 : index
    %c0_122 = arith.constant 0 : index
    %110 = vector.load %arg5[%c0_121, %c0_122] : memref<8x300xf32, #tpu.memory_space<vmem>>, vector<8x288xf32>
    tpu.vector_store %arg5[%c0_121, %c0_122], %109 {strides = array<i32>} : memref<8x300xf32, #tpu.memory_space<vmem>>, vector<8x288xf32>,
    %c15 = arith.constant 15 : index
    %c0_123 = arith.constant 0 : index
    %c0_124 = arith.constant 0 : index
    %111 = vector.load %arg2[%c15, %c0_123, %c0_124] : memref<25x8x4xf32, #tpu.memory_space<vmem>>, vector<1x8x4xf32>
    %112 = vector.shape_cast %111 : vector<1x8x4xf32> to vector<8x4xf32>
    %cst_125 = arith.constant dense<0.000000e+00> : vector<8x300xf32>
    %113 = tpu.matmul %112, %7, %cst_125 {dimension_numbers = #tpu.dot_dimension_numbers<[1], [0], [0], [1], [0, 0, 1, 1], [], []>} : vector<8x4xf32>, vector<4x300xf32>, vector<8x300xf32> -> vector<8x300xf32>
    %c0_126 = arith.constant 0 : index
    %c0_127 = arith.constant 0 : index
    %114 = vector.load %arg5[%c0_126, %c0_127] : memref<8x300xf32, #tpu.memory_space<vmem>>, vector<8x290xf32>
    %115 = vector.extract_strided_slice %113 {offsets = [0, 10], sizes = [8, 290], strides = [1, 1]} : vector<8x300xf32> to vector<8x290xf32>
    %116 = arith.addf %114, %115 : vector<8x290xf32>
    %c0_128 = arith.constant 0 : index
    %c0_129 = arith.constant 0 : index
    %117 = vector.load %arg5[%c0_128, %c0_129] : memref<8x300xf32, #tpu.memory_space<vmem>>, vector<8x290xf32>
    tpu.vector_store %arg5[%c0_128, %c0_129], %116 {strides = array<i32>} : memref<8x300xf32, #tpu.memory_space<vmem>>, vector<8x290xf32>,
    %c16 = arith.constant 16 : index
    %c0_130 = arith.constant 0 : index
    %c0_131 = arith.constant 0 : index
    %118 = vector.load %arg2[%c16, %c0_130, %c0_131] : memref<25x8x4xf32, #tpu.memory_space<vmem>>, vector<1x8x4xf32>
    %119 = vector.shape_cast %118 : vector<1x8x4xf32> to vector<8x4xf32>
    %cst_132 = arith.constant dense<0.000000e+00> : vector<8x300xf32>
    %120 = tpu.matmul %119, %9, %cst_132 {dimension_numbers = #tpu.dot_dimension_numbers<[1], [0], [0], [1], [0, 0, 1, 1], [], []>} : vector<8x4xf32>, vector<4x300xf32>, vector<8x300xf32> -> vector<8x300xf32>
    %c0_133 = arith.constant 0 : index
    %c0_134 = arith.constant 0 : index
    %121 = vector.load %arg5[%c0_133, %c0_134] : memref<8x300xf32, #tpu.memory_space<vmem>>, vector<8x290xf32>
    %122 = vector.extract_strided_slice %120 {offsets = [0, 10], sizes = [8, 290], strides = [1, 1]} : vector<8x300xf32> to vector<8x290xf32>
    %123 = arith.addf %121, %122 : vector<8x290xf32>
    %c0_135 = arith.constant 0 : index
    %c0_136 = arith.constant 0 : index
    %124 = vector.load %arg5[%c0_135, %c0_136] : memref<8x300xf32, #tpu.memory_space<vmem>>, vector<8x290xf32>
    tpu.vector_store %arg5[%c0_135, %c0_136], %123 {strides = array<i32>} : memref<8x300xf32, #tpu.memory_space<vmem>>, vector<8x290xf32>,
    %c17 = arith.constant 17 : index
    %c0_137 = arith.constant 0 : index
    %c0_138 = arith.constant 0 : index
    %125 = vector.load %arg2[%c17, %c0_137, %c0_138] : memref<25x8x4xf32, #tpu.memory_space<vmem>>, vector<1x8x4xf32>
    %126 = vector.shape_cast %125 : vector<1x8x4xf32> to vector<8x4xf32>
    %cst_139 = arith.constant dense<0.000000e+00> : vector<8x300xf32>
    %127 = tpu.matmul %126, %7, %cst_139 {dimension_numbers = #tpu.dot_dimension_numbers<[1], [0], [0], [1], [0, 0, 1, 1], [], []>} : vector<8x4xf32>, vector<4x300xf32>, vector<8x300xf32> -> vector<8x300xf32>
    %c0_140 = arith.constant 0 : index
    %c0_141 = arith.constant 0 : index
    %128 = vector.load %arg5[%c0_140, %c0_141] : memref<8x300xf32, #tpu.memory_space<vmem>>, vector<8x289xf32>
    %129 = vector.extract_strided_slice %127 {offsets = [0, 11], sizes = [8, 289], strides = [1, 1]} : vector<8x300xf32> to vector<8x289xf32>
    %130 = arith.addf %128, %129 : vector<8x289xf32>
    %c0_142 = arith.constant 0 : index
    %c0_143 = arith.constant 0 : index
    %131 = vector.load %arg5[%c0_142, %c0_143] : memref<8x300xf32, #tpu.memory_space<vmem>>, vector<8x289xf32>
    tpu.vector_store %arg5[%c0_142, %c0_143], %130 {strides = array<i32>} : memref<8x300xf32, #tpu.memory_space<vmem>>, vector<8x289xf32>,
    %c18 = arith.constant 18 : index
    %c0_144 = arith.constant 0 : index
    %c0_145 = arith.constant 0 : index
    %132 = vector.load %arg2[%c18, %c0_144, %c0_145] : memref<25x8x4xf32, #tpu.memory_space<vmem>>, vector<1x8x4xf32>
    %133 = vector.shape_cast %132 : vector<1x8x4xf32> to vector<8x4xf32>
    %cst_146 = arith.constant dense<0.000000e+00> : vector<8x300xf32>
    %134 = tpu.matmul %133, %9, %cst_146 {dimension_numbers = #tpu.dot_dimension_numbers<[1], [0], [0], [1], [0, 0, 1, 1], [], []>} : vector<8x4xf32>, vector<4x300xf32>, vector<8x300xf32> -> vector<8x300xf32>
    %c0_147 = arith.constant 0 : index
    %c0_148 = arith.constant 0 : index
    %135 = vector.load %arg5[%c0_147, %c0_148] : memref<8x300xf32, #tpu.memory_space<vmem>>, vector<8x289xf32>
    %136 = vector.extract_strided_slice %134 {offsets = [0, 11], sizes = [8, 289], strides = [1, 1]} : vector<8x300xf32> to vector<8x289xf32>
    %137 = arith.addf %135, %136 : vector<8x289xf32>
    %c0_149 = arith.constant 0 : index
    %c0_150 = arith.constant 0 : index
    %138 = vector.load %arg5[%c0_149, %c0_150] : memref<8x300xf32, #tpu.memory_space<vmem>>, vector<8x289xf32>
    tpu.vector_store %arg5[%c0_149, %c0_150], %137 {strides = array<i32>} : memref<8x300xf32, #tpu.memory_space<vmem>>, vector<8x289xf32>,
    %c19 = arith.constant 19 : index
    %c0_151 = arith.constant 0 : index
    %c0_152 = arith.constant 0 : index
    %139 = vector.load %arg2[%c19, %c0_151, %c0_152] : memref<25x8x4xf32, #tpu.memory_space<vmem>>, vector<1x8x4xf32>
    %140 = vector.shape_cast %139 : vector<1x8x4xf32> to vector<8x4xf32>
    %cst_153 = arith.constant dense<0.000000e+00> : vector<8x300xf32>
    %141 = tpu.matmul %140, %7, %cst_153 {dimension_numbers = #tpu.dot_dimension_numbers<[1], [0], [0], [1], [0, 0, 1, 1], [], []>} : vector<8x4xf32>, vector<4x300xf32>, vector<8x300xf32> -> vector<8x300xf32>
    %c0_154 = arith.constant 0 : index
    %c0_155 = arith.constant 0 : index
    %142 = vector.load %arg5[%c0_154, %c0_155] : memref<8x300xf32, #tpu.memory_space<vmem>>, vector<8x288xf32>
    %143 = vector.extract_strided_slice %141 {offsets = [0, 12], sizes = [8, 288], strides = [1, 1]} : vector<8x300xf32> to vector<8x288xf32>
    %144 = arith.addf %142, %143 : vector<8x288xf32>
    %c0_156 = arith.constant 0 : index
    %c0_157 = arith.constant 0 : index
    %145 = vector.load %arg5[%c0_156, %c0_157] : memref<8x300xf32, #tpu.memory_space<vmem>>, vector<8x288xf32>
    tpu.vector_store %arg5[%c0_156, %c0_157], %144 {strides = array<i32>} : memref<8x300xf32, #tpu.memory_space<vmem>>, vector<8x288xf32>,
    %c20 = arith.constant 20 : index
    %c0_158 = arith.constant 0 : index
    %c0_159 = arith.constant 0 : index
    %146 = vector.load %arg2[%c20, %c0_158, %c0_159] : memref<25x8x4xf32, #tpu.memory_space<vmem>>, vector<1x8x4xf32>
    %147 = vector.shape_cast %146 : vector<1x8x4xf32> to vector<8x4xf32>
    %cst_160 = arith.constant dense<0.000000e+00> : vector<8x300xf32>
    %148 = tpu.matmul %147, %3, %cst_160 {dimension_numbers = #tpu.dot_dimension_numbers<[1], [0], [0], [1], [0, 0, 1, 1], [], []>} : vector<8x4xf32>, vector<4x300xf32>, vector<8x300xf32> -> vector<8x300xf32>
    %c0_161 = arith.constant 0 : index
    %c0_162 = arith.constant 0 : index
    %149 = vector.load %arg5[%c0_161, %c0_162] : memref<8x300xf32, #tpu.memory_space<vmem>>, vector<8x280xf32>
    %150 = vector.extract_strided_slice %148 {offsets = [0, 20], sizes = [8, 280], strides = [1, 1]} : vector<8x300xf32> to vector<8x280xf32>
    %151 = arith.addf %149, %150 : vector<8x280xf32>
    %c0_163 = arith.constant 0 : index
    %c0_164 = arith.constant 0 : index
    %152 = vector.load %arg5[%c0_163, %c0_164] : memref<8x300xf32, #tpu.memory_space<vmem>>, vector<8x280xf32>
    tpu.vector_store %arg5[%c0_163, %c0_164], %151 {strides = array<i32>} : memref<8x300xf32, #tpu.memory_space<vmem>>, vector<8x280xf32>,
    %c21 = arith.constant 21 : index
    %c0_165 = arith.constant 0 : index
    %c0_166 = arith.constant 0 : index
    %153 = vector.load %arg2[%c21, %c0_165, %c0_166] : memref<25x8x4xf32, #tpu.memory_space<vmem>>, vector<1x8x4xf32>
    %154 = vector.shape_cast %153 : vector<1x8x4xf32> to vector<8x4xf32>
    %cst_167 = arith.constant dense<0.000000e+00> : vector<8x300xf32>
    %155 = tpu.matmul %154, %5, %cst_167 {dimension_numbers = #tpu.dot_dimension_numbers<[1], [0], [0], [1], [0, 0, 1, 1], [], []>} : vector<8x4xf32>, vector<4x300xf32>, vector<8x300xf32> -> vector<8x300xf32>
    %c0_168 = arith.constant 0 : index
    %c0_169 = arith.constant 0 : index
    %156 = vector.load %arg5[%c0_168, %c0_169] : memref<8x300xf32, #tpu.memory_space<vmem>>, vector<8x280xf32>
    %157 = vector.extract_strided_slice %155 {offsets = [0, 20], sizes = [8, 280], strides = [1, 1]} : vector<8x300xf32> to vector<8x280xf32>
    %158 = arith.addf %156, %157 : vector<8x280xf32>
    %c0_170 = arith.constant 0 : index
    %c0_171 = arith.constant 0 : index
    %159 = vector.load %arg5[%c0_170, %c0_171] : memref<8x300xf32, #tpu.memory_space<vmem>>, vector<8x280xf32>
    tpu.vector_store %arg5[%c0_170, %c0_171], %158 {strides = array<i32>} : memref<8x300xf32, #tpu.memory_space<vmem>>, vector<8x280xf32>,
    %c22 = arith.constant 22 : index
    %c0_172 = arith.constant 0 : index
    %c0_173 = arith.constant 0 : index
    %160 = vector.load %arg2[%c22, %c0_172, %c0_173] : memref<25x8x4xf32, #tpu.memory_space<vmem>>, vector<1x8x4xf32>
    %161 = vector.shape_cast %160 : vector<1x8x4xf32> to vector<8x4xf32>
    %cst_174 = arith.constant dense<0.000000e+00> : vector<8x300xf32>
    %162 = tpu.matmul %161, %3, %cst_174 {dimension_numbers = #tpu.dot_dimension_numbers<[1], [0], [0], [1], [0, 0, 1, 1], [], []>} : vector<8x4xf32>, vector<4x300xf32>, vector<8x300xf32> -> vector<8x300xf32>
    %c0_175 = arith.constant 0 : index
    %c0_176 = arith.constant 0 : index
    %163 = vector.load %arg5[%c0_175, %c0_176] : memref<8x300xf32, #tpu.memory_space<vmem>>, vector<8x279xf32>
    %164 = vector.extract_strided_slice %162 {offsets = [0, 21], sizes = [8, 279], strides = [1, 1]} : vector<8x300xf32> to vector<8x279xf32>
    %165 = arith.addf %163, %164 : vector<8x279xf32>
    %c0_177 = arith.constant 0 : index
    %c0_178 = arith.constant 0 : index
    %166 = vector.load %arg5[%c0_177, %c0_178] : memref<8x300xf32, #tpu.memory_space<vmem>>, vector<8x279xf32>
    tpu.vector_store %arg5[%c0_177, %c0_178], %165 {strides = array<i32>} : memref<8x300xf32, #tpu.memory_space<vmem>>, vector<8x279xf32>,
    %c23 = arith.constant 23 : index
    %c0_179 = arith.constant 0 : index
    %c0_180 = arith.constant 0 : index
    %167 = vector.load %arg2[%c23, %c0_179, %c0_180] : memref<25x8x4xf32, #tpu.memory_space<vmem>>, vector<1x8x4xf32>
    %168 = vector.shape_cast %167 : vector<1x8x4xf32> to vector<8x4xf32>
    %cst_181 = arith.constant dense<0.000000e+00> : vector<8x300xf32>
    %169 = tpu.matmul %168, %5, %cst_181 {dimension_numbers = #tpu.dot_dimension_numbers<[1], [0], [0], [1], [0, 0, 1, 1], [], []>} : vector<8x4xf32>, vector<4x300xf32>, vector<8x300xf32> -> vector<8x300xf32>
    %c0_182 = arith.constant 0 : index
    %c0_183 = arith.constant 0 : index
    %170 = vector.load %arg5[%c0_182, %c0_183] : memref<8x300xf32, #tpu.memory_space<vmem>>, vector<8x279xf32>
    %171 = vector.extract_strided_slice %169 {offsets = [0, 21], sizes = [8, 279], strides = [1, 1]} : vector<8x300xf32> to vector<8x279xf32>
    %172 = arith.addf %170, %171 : vector<8x279xf32>
    %c0_184 = arith.constant 0 : index
    %c0_185 = arith.constant 0 : index
    %173 = vector.load %arg5[%c0_184, %c0_185] : memref<8x300xf32, #tpu.memory_space<vmem>>, vector<8x279xf32>
    tpu.vector_store %arg5[%c0_184, %c0_185], %172 {strides = array<i32>} : memref<8x300xf32, #tpu.memory_space<vmem>>, vector<8x279xf32>,
    %c24 = arith.constant 24 : index
    %c0_186 = arith.constant 0 : index
    %c0_187 = arith.constant 0 : index
    %174 = vector.load %arg2[%c24, %c0_186, %c0_187] : memref<25x8x4xf32, #tpu.memory_space<vmem>>, vector<1x8x4xf32>
    %175 = vector.shape_cast %174 : vector<1x8x4xf32> to vector<8x4xf32>
    %cst_188 = arith.constant dense<0.000000e+00> : vector<8x300xf32>
    %176 = tpu.matmul %175, %3, %cst_188 {dimension_numbers = #tpu.dot_dimension_numbers<[1], [0], [0], [1], [0, 0, 1, 1], [], []>} : vector<8x4xf32>, vector<4x300xf32>, vector<8x300xf32> -> vector<8x300xf32>
    %c0_189 = arith.constant 0 : index
    %c0_190 = arith.constant 0 : index
    %177 = vector.load %arg5[%c0_189, %c0_190] : memref<8x300xf32, #tpu.memory_space<vmem>>, vector<8x278xf32>
    %178 = vector.extract_strided_slice %176 {offsets = [0, 22], sizes = [8, 278], strides = [1, 1]} : vector<8x300xf32> to vector<8x278xf32>
    %179 = arith.addf %177, %178 : vector<8x278xf32>
    %c0_191 = arith.constant 0 : index
    %c0_192 = arith.constant 0 : index
    %180 = vector.load %arg5[%c0_191, %c0_192] : memref<8x300xf32, #tpu.memory_space<vmem>>, vector<8x278xf32>
    tpu.vector_store %arg5[%c0_191, %c0_192], %179 {strides = array<i32>} : memref<8x300xf32, #tpu.memory_space<vmem>>, vector<8x278xf32>,
    %c0_193 = arith.constant 0 : index
    %c0_194 = arith.constant 0 : index
    %181 = vector.load %arg5[%c0_193, %c0_194] : memref<8x300xf32, #tpu.memory_space<vmem>>, vector<8x300xf32>
    %c0_195 = arith.constant 0 : index
    %c0_196 = arith.constant 0 : index
    %182 = vector.load %arg3[%c0_195, %c0_196] : memref<8x1xf32, #tpu.memory_space<vmem>>, vector<8x1xf32>
    %183 = vector.broadcast %182 : vector<8x1xf32> to vector<8x300xf32>
    %184 = arith.addf %181, %183 : vector<8x300xf32>
    %cst_197 = arith.constant 0.000000e+00 : f32
    %185 = vector.broadcast %cst_197 : f32 to vector<8x300xf32>
    %186 = arith.maximumf %184, %185 : vector<8x300xf32>
    %c0_198 = arith.constant 0 : index
    %c0_199 = arith.constant 0 : index
    %c0_200 = arith.constant 0 : index
    %187 = vector.load %arg4[%c0_198, %c0_199, %c0_200] : memref<1x8x300xf32, #tpu.memory_space<vmem>>, vector<1x8x300xf32>
    %188 = vector.shape_cast %187 : vector<1x8x300xf32> to vector<8x300xf32>
    %189 = vector.shape_cast %186 : vector<8x300xf32> to vector<1x8x300xf32>
    tpu.vector_store %arg4[%c0_198, %c0_199, %c0_200], %189 {strides = array<i32>} : memref<1x8x300xf32, #tpu.memory_space<vmem>>, vector<1x8x300xf32>,
    return
  }
  func.func @transform_0(%arg0: i32) -> (i32, i32, i32, i32) {
    %c0_i32 = arith.constant 0 : i32
    %c0_i32_0 = arith.constant 0 : i32
    %c0_i32_1 = arith.constant 0 : i32
    %c0_i32_2 = arith.constant 0 : i32
    return %arg0, %c0_i32, %c0_i32_0, %c0_i32_1 : i32, i32, i32, i32
  }
  func.func @transform_1(%arg0: i32) -> (i32, i32, i32) {
    %c0_i32 = arith.constant 0 : i32
    %c0_i32_0 = arith.constant 0 : i32
    %c0_i32_1 = arith.constant 0 : i32
    %c0_i32_2 = arith.constant 0 : i32
    return %c0_i32, %c0_i32_0, %c0_i32_1 : i32, i32, i32
  }
  func.func @transform_2(%arg0: i32) -> (i32, i32) {
    %c0_i32 = arith.constant 0 : i32
    %c0_i32_0 = arith.constant 0 : i32
    %c0_i32_1 = arith.constant 0 : i32
    return %c0_i32, %c0_i32_0 : i32, i32
  }
  func.func @transform_3(%arg0: i32) -> (i32, i32, i32) {
    %c0_i32 = arith.constant 0 : i32
    %c0_i32_0 = arith.constant 0 : i32
    %c0_i32_1 = arith.constant 0 : i32
    return %arg0, %c0_i32, %c0_i32_0 : i32, i32, i32
  }
}

</mosaic_0001>

<bundles_post_ra>
// kernel: init_block_forward.1
= control target key start
LH: loop header
LB: loop body
LE: loop exit
PB: predicated region body
PF: predicated region fallthrough
CT: control target
= control target key end

     0   :  { %s4886_s12 = smov 0   ;;  %s5507_s0 = inlined_call_operand.vmem [shape: f32[2,4,4,300], index: 0, kind: input, shape index: {}]   ;;  %s5508_s1 = inlined_call_operand.vmem [shape: f32[25,8,4], index: 1, kind: input, shape index: {}]   ;;  %s5509_s2 = inlined_call_operand.vmem [shape: f32[8,1], index: 2, kind: input, shape index: {}]   ;;  %s5510_s3 = inlined_call_operand.vmem [shape: f32[2,8,300], index: 3, kind: output, shape index: {}]  }
   0x1 LB: > { %s4481_s13 = sadd.s32 4294967295, %s4853_s12   ;;  %p4485_p0 = scmp.ge.s32.totalorder %s4853_s12, 1  ;;  %s4853_s12 = sphi %s4886_s12, %s13_s12  }
   0x2   : > { %p137_p1 = scmp.lt.s32.totalorder %s4853_s12, 3 }
   0x4   : > { %p138_p2 = pnand %p4485_p0, %p137_p1 }
   0x5   : > { %p161_p3 = scmp.lt.s32.totalorder (!%p138_p2), %s4481_s13, 1  ;;  %v4855_v0 = vmov (!%p138_p2), 0.0   ;;  %vm4856_vm0 = vmmov (!%p138_p2), 0   ;;  %vm173_vm1 = vcmask (!%p138_p2), 359424   ;;  %vm194_vm2 = vcmask (!%p138_p2), 1043456   ;;  %v186_v1 = vld [vmem:[%s5508_s1] sm:$0xff] (!%p138_p2) }
   0x6   : > { %141 = sbr.rel (%p138_p2) target bundleno = 590 (0x24e), region = 32  ;;  %4695 = vmatprep.subr.mxu1 (!%p138_p2), %v4855_v0  ;;  %4697 = vmatprep.mubr.msk.f32.mxu1 (!%p138_p2), %vm4856_vm0, %v4855_v0  ;;  %174 = vst.msk [vmem:[#allocation2 + $0x10] sm:$0xff] (!%p138_p2), %vm173_vm1, %v4855_v0  ;;  %vm190_vm3 = vcmask (!%p138_p2), 31744   ;;  %v4499_v8 = vld [vmem:[%s5508_s1 + $0x8] sm:$0xff] (!%p138_p2)  ;;  %v4505_v9 = vld [vmem:[%s5508_s1 + $0x10] sm:$0xff] (!%p138_p2)  ;;  %v4511_v11 = vld [vmem:[%s5508_s1 + $0x18] sm:$0xff] (!%p138_p2) }
   0x7   : > { %265 = vmatprep.mubr.f32.mxu0 (!%p138_p2), %v4855_v0  ;;  %v4517_v14 = vld [vmem:[%s5508_s1 + $0x20] sm:$0xff] (!%p138_p2)  ;;  %v4523_v17 = vld [vmem:[%s5508_s1 + $0x28] sm:$0xff] (!%p138_p2)  ;;  %v4529_v19 = vld [vmem:[%s5508_s1 + $0x30] sm:$0xff] (!%p138_p2)  ;;  %s4857_s18 = smov (!%p138_p2), 127   ;;  %v4858_v55 = vmov (!%p138_p2), 0   ;;  %s4859_s19 = smov (!%p138_p2), 126  }
   0x8   : > { %v4535_v20 = vld [vmem:[%s5508_s1 + $0x38] sm:$0xff] (!%p138_p2)  ;;  %v4541_v21 = vld [vmem:[%s5508_s1 + $0x40] sm:$0xff] (!%p138_p2)  ;;  %v4547_v22 = vld [vmem:[%s5508_s1 + $0x48] sm:$0xff] (!%p138_p2)  ;;  %4841 = vset.pattern.permute.xlu1 (!%p138_p2), %v4858_v55  ;;  %4842 = vset.pattern.permute.xlu0 (!%p138_p2), %v4858_v55  ;;  %s4860_s20 = smov (!%p138_p2), 118   ;;  %s4861_s21 = smov (!%p138_p2), 117   ;;  %vm684_vm4 = vcmask (!%p138_p2), 351232  }
   0x9   : > { %v4553_v23 = vld [vmem:[%s5508_s1 + $0x50] sm:$0xff] (!%p138_p2)  ;;  %v4559_v24 = vld [vmem:[%s5508_s1 + $0x58] sm:$0xff] (!%p138_p2)  ;;  %v4565_v25 = vld [vmem:[%s5508_s1 + $0x60] sm:$0xff] (!%p138_p2)  ;;  %s4862_s22 = smov (!%p138_p2), 116   ;;  %s4863_s23 = smov (!%p138_p2), 108   ;;  %vm673_vm5 = vcmask (!%p138_p2), 1039360  }
   0xa   : > { %v4571_v26 = vld [vmem:[%s5508_s1 + $0x68] sm:$0xff] (!%p138_p2)  ;;  %v4577_v27 = vld [vmem:[%s5508_s1 + $0x70] sm:$0xff] (!%p138_p2)  ;;  %v4583_v28 = vld [vmem:[%s5508_s1 + $0x78] sm:$0xff] (!%p138_p2)  ;;  %s4864_s24 = smov (!%p138_p2), 107   ;;  %s4865_s25 = smov (!%p138_p2), 106   ;;  %vm1013_vm6 = vcmask (!%p138_p2), 1031168  }
   0xb   : > { %v4589_v29 = vld [vmem:[%s5508_s1 + $0x80] sm:$0xff] (!%p138_p2)  ;;  %v4595_v30 = vld [vmem:[%s5508_s1 + $0x88] sm:$0xff] (!%p138_p2)  ;;  %v4601_v31 = vld [vmem:[%s5508_s1 + $0x90] sm:$0xff] (!%p138_p2)  ;;  %vm1024_vm7 = vcmask (!%p138_p2), 343040   ;;  %vm2030_vm8 = vcmask (!%p138_p2), 277504   ;;  %vm2019_vm9 = vcmask (!%p138_p2), 965632  }
   0xc   : > { %v4607_v32 = vld [vmem:[%s5508_s1 + $0x98] sm:$0xff] (!%p138_p2)  ;;  %v4613_v33 = vld [vmem:[%s5508_s1 + $0xa0] sm:$0xff] (!%p138_p2)  ;;  %v4619_v34 = vld [vmem:[%s5508_s1 + $0xa8] sm:$0xff] (!%p138_p2)  ;;  %vm2359_vm10 = vcmask (!%p138_p2), 957440   ;;  %vm2370_vm11 = vcmask (!%p138_p2), 269312   ;;  %vm2699_vm12 = vcmask (!%p138_p2), 949248  }
   0xd   : > { %s5512_s13 = smov (!%p161_p3, %s4481_s13), 1  ;;  %v4625_v35 = vld [vmem:[%s5508_s1 + $0xb0] sm:$0xff]  ;;  %v4631_v36 = vld [vmem:[%s5508_s1 + $0xb8] sm:$0xff]  ;;  %v4637_v37 = vld [vmem:[%s5508_s1 + $0xc0] sm:$0xff]  ;;  %vm3715_vm13 = vcmask 883712   ;;  %vm4055_vm14 = vcmask 875520  }
   0xe   : > { %s4820_s14 = smul.u32 48, %s5512_s13  ;;  %v344_v38 = vld [vmem:[#allocation2 + $0x10] sm:$0xff]  ;;  %vm2710_vm15 = vcmask 261120  }
   0xf   : > { %s4821_s28 = smul.u32 24, %s5512_s13 }
  0x10   : > { %s4906_s17 = scalar_lea.vmem %s5507_s0, %s4820_s14 }
  0x11   : > { %v4912_v2 = vld [vmem:[%s4906_s17] sm:$0xff]  ;;  %v4915_v3 = vld [vmem:[%s4906_s17 + $0x8] sm:$0xf]  ;;  %v4918_v4 = vld [vmem:[%s4906_s17 + $0xc] sm:$0xff]  ;;  %s5489_s4 = scalar_lea.vmem %s5510_s3, %s4821_s28 }
  0x12   : > { %4696 = vmatpush3.msk.msra.mxu1 %vm194_vm2, %v4915_v3  ;;  %v4924_v5 = vcombine.high %v4912_v2, %v4912_v2  ;;  %v4928_v6 = vcombine.high %v4918_v4, %v4918_v4  ;;  %v4931_v7 = vld [vmem:[%s4906_s17 + $0x14] sm:$0xf]  ;;  %v4974_v10 = vld [vmem:[%s4906_s17 + $0x18] sm:$0xff]  ;;  %v4996_v13 = vld [vmem:[%s4906_s17 + $0x24] sm:$0xff] }
  0x13   : > { %4698 = vmatmul.mubr.msk.f32.vlgmr.msra.gmra.mrb[0].mxu1 %vm190_vm3, %v186_v1  ;;  %4700 = vmatprep.subr.mxu1 %v4855_v0  ;;  %v4990_v12 = vcombine.high %v4974_v10, %v4974_v10  ;;  %v5008_v15 = vld [vmem:[%s4906_s17 + $0x20] sm:$0xf]  ;;  %v5015_v16 = vcombine.high %v4996_v13, %v4996_v13  ;;  %v5030_v18 = vld [vmem:[%s4906_s17 + $0x2c] sm:$0xf] }
  0x14   : > { %4494 = vmatprep.subr.msk.mxu0 %vm194_vm2, %v4924_v5  ;;  %4701 = vmatpush3.msk.msra.mxu1 %vm194_vm2, %v4931_v7 }
  0x15   : > { %4495 = vmatpush1.msk.msra.mxu0 %vm194_vm2, %v4912_v2  ;;  %4702 = vmatprep.mubr.msk.f32.mxu1 %vm4856_vm0, %v4855_v0 }
  0x16   : > { %4496 = vmatmul.mubr.msk.f32.vlgmr.msra.gmra.mrb[0].mxu0 %vm190_vm3, %v186_v1  ;;  %4500 = vmatprep.subr.msk.mxu0 %vm194_vm2, %v4928_v6 }
  0x17   : > { %4501 = vmatpush1.msk.msra.mxu0 %vm194_vm2, %v4918_v4  ;;  %4703 = vmatmul.mubr.msk.f32.vlgmr.msra.gmra.mrb[2].mxu1 %vm190_vm3, %v4499_v8 }
  0x18   : > { %429 = vmatprep.mubr.f32.mxu0 %v4855_v0  ;;  %4705 = vmatprep.subr.mxu1 %v4855_v0 }
  0x19   : > { %4506 = vmatprep.subr.msk.mxu0 %vm194_vm2, %v4924_v5  ;;  %4706 = vmatpush3.msk.msra.mxu1 %vm194_vm2, %v4915_v3 }
  0x1a   : > { %4502 = vmatmul.mubr.msk.f32.vlgmr.msra.gmra.mrb[2].mxu0 %vm190_vm3, %v4499_v8  ;;  %4707 = vmatprep.mubr.msk.f32.mxu1 %vm4856_vm0, %v4855_v0 }
  0x1b   : > { %4507 = vmatpush1.msk.msra.mxu0 %vm194_vm2, %v4912_v2  ;;  %4708 = vmatmul.mubr.msk.f32.vlgmr.msra.gmra.mrb[4].mxu1 %vm190_vm3, %v4505_v9 }
  0x1c   : > { %584 = vmatprep.mubr.f32.mxu0 %v4855_v0  ;;  %4512 = vmatprep.subr.msk.mxu0 %vm194_vm2, %v4928_v6 }
  0x1d   : > { %4710 = vmatprep.subr.mxu1 %v4855_v0  ;;  %4712 = vmatprep.mubr.msk.f32.mxu1 %vm4856_vm0, %v4855_v0 }
  0x1e   : > { %4508 = vmatmul.mubr.msk.f32.vlgmr.msra.gmra.mrb[4].mxu0 %vm190_vm3, %v4505_v9  ;;  %4711 = vmatpush3.msk.msra.mxu1 %vm194_vm2, %v4931_v7 }
  0x1f   : > { %4513 = vmatpush1.msk.msra.mxu0 %vm194_vm2, %v4918_v4  ;;  %755 = vmatprep.mubr.f32.mxu0 %v4855_v0 }
  0x20   : > { %4713 = vmatmul.mubr.msk.f32.vlgmr.msra.gmra.mrb[6].mxu1 %vm190_vm3, %v4511_v11  ;;  %4518 = vmatprep.subr.msk.mxu0 %vm194_vm2, %v4924_v5 }
  0x21   : > { %4715 = vmatprep.subr.mxu1 %v4855_v0  ;;  %4717 = vmatprep.mubr.msk.f32.mxu1 %vm4856_vm0, %v4855_v0 }
  0x22   : > { %4514 = vmatmul.mubr.msk.f32.vlgmr.msra.gmra.mrb[6].mxu0 %vm190_vm3, %v4511_v11  ;;  %4716 = vmatpush3.msk.msra.mxu1 %vm194_vm2, %v4915_v3 }
  0x23   : > { %4519 = vmatpush1.msk.msra.mxu0 %vm194_vm2, %v4912_v2  ;;  %924 = vmatprep.mubr.f32.mxu0 %v4855_v0 }
  0x24   : > { %4718 = vmatmul.mubr.msk.f32.vlgmr.msra.gmra.mrb[8].mxu1 %vm190_vm3, %v4517_v14  ;;  %4524 = vmatprep.subr.msk.mxu0 %vm194_vm2, %v4990_v12 }
  0x25   : > { %4720 = vmatprep.subr.mxu1 %v4855_v0  ;;  %4722 = vmatprep.mubr.msk.f32.mxu1 %vm4856_vm0, %v4855_v0 }
  0x26   : > { %4520 = vmatmul.mubr.msk.f32.vlgmr.msra.gmra.mrb[8].mxu0 %vm190_vm3, %v4517_v14  ;;  %4721 = vmatpush3.msk.msra.mxu1 %vm194_vm2, %v5008_v15 }
  0x27   : > { %4525 = vmatpush1.msk.msra.mxu0 %vm194_vm2, %v4974_v10  ;;  %1104 = vmatprep.mubr.f32.mxu0 %v4855_v0 }
  0x28   : > { %4530 = vmatprep.subr.msk.mxu0 %vm194_vm2, %v5015_v16  ;;  %4723 = vmatmul.mubr.msk.f32.vlgmr.msra.gmra.mrb[10].mxu1 %vm190_vm3, %v4523_v17 }
  0x29   : > { %4725 = vmatprep.subr.mxu1 %v4855_v0  ;;  %4727 = vmatprep.mubr.msk.f32.mxu1 %vm4856_vm0, %v4855_v0 }
  0x2a   : > { %4526 = vmatmul.mubr.msk.f32.vlgmr.msra.gmra.mrb[10].mxu0 %vm190_vm3, %v4523_v17  ;;  %4726 = vmatpush3.msk.msra.mxu1 %vm194_vm2, %v5030_v18 }
  0x2b   : > { %4531 = vmatpush1.msk.msra.mxu0 %vm194_vm2, %v4996_v13  ;;  %1268 = vmatprep.mubr.f32.mxu0 %v4855_v0 }
  0x2c   : > { %4536 = vmatprep.subr.msk.mxu0 %vm194_vm2, %v4990_v12  ;;  %4728 = vmatmul.mubr.msk.f32.vlgmr.msra.gmra.mrb[12].mxu1 %vm190_vm3, %v4529_v19 }
  0x2d   : > { %4730 = vmatprep.subr.mxu1 %v4855_v0  ;;  %4732 = vmatprep.mubr.msk.f32.mxu1 %vm4856_vm0, %v4855_v0 }
  0x2e   : > { %4532 = vmatmul.mubr.msk.f32.vlgmr.msra.gmra.mrb[12].mxu0 %vm190_vm3, %v4529_v19  ;;  %4731 = vmatpush3.msk.msra.mxu1 %vm194_vm2, %v5008_v15 }
  0x2f   : > { %4537 = vmatpush1.msk.msra.mxu0 %vm194_vm2, %v4974_v10  ;;  %1423 = vmatprep.mubr.f32.mxu0 %v4855_v0 }
  0x30   : > { %4733 = vmatmul.mubr.msk.f32.vlgmr.msra.gmra.mrb[14].mxu1 %vm190_vm3, %v4535_v20  ;;  %4542 = vmatprep.subr.msk.mxu0 %vm194_vm2, %v5015_v16 }
  0x31   : > { %4735 = vmatprep.subr.mxu1 %v4855_v0  ;;  %4737 = vmatprep.mubr.msk.f32.mxu1 %vm4856_vm0, %v4855_v0 }
  0x32   : > { %4538 = vmatmul.mubr.msk.f32.vlgmr.msra.gmra.mrb[14].mxu0 %vm190_vm3, %v4535_v20  ;;  %4736 = vmatpush3.msk.msra.mxu1 %vm194_vm2, %v5030_v18 }
  0x33   : > { %4543 = vmatpush1.msk.msra.mxu0 %vm194_vm2, %v4996_v13  ;;  %1592 = vmatprep.mubr.f32.mxu0 %v4855_v0 }
  0x34   : > { %4738 = vmatmul.mubr.msk.f32.vlgmr.msra.gmra.mrb[16].mxu1 %vm190_vm3, %v4541_v21  ;;  %4548 = vmatprep.subr.msk.mxu0 %vm194_vm2, %v4990_v12 }
  0x35   : > { %4740 = vmatprep.subr.mxu1 %v4855_v0  ;;  %4742 = vmatprep.mubr.msk.f32.mxu1 %vm4856_vm0, %v4855_v0 }
  0x36   : > { %4544 = vmatmul.mubr.msk.f32.vlgmr.msra.gmra.mrb[16].mxu0 %vm190_vm3, %v4541_v21  ;;  %4741 = vmatpush3.msk.msra.mxu1 %vm194_vm2, %v5008_v15 }
  0x37   : > { %4549 = vmatpush1.msk.msra.mxu0 %vm194_vm2, %v4974_v10  ;;  %1761 = vmatprep.mubr.f32.mxu0 %v4855_v0 }
  0x38   : > { %4743 = vmatmul.mubr.msk.f32.vlgmr.msra.gmra.mrb[18].mxu1 %vm190_vm3, %v4547_v22  ;;  %4554 = vmatprep.subr.msk.mxu0 %vm194_vm2, %v4924_v5 }
  0x39   : > { %4745 = vmatprep.subr.mxu1 %v4855_v0  ;;  %4747 = vmatprep.mubr.msk.f32.mxu1 %vm4856_vm0, %v4855_v0 }
  0x3a   : > { %4550 = vmatmul.mubr.msk.f32.vlgmr.msra.gmra.mrb[18].mxu0 %vm190_vm3, %v4547_v22  ;;  %4746 = vmatpush3.msk.msra.mxu1 %vm194_vm2, %v4915_v3 }
  0x3b   : > { %4555 = vmatpush1.msk.msra.mxu0 %vm194_vm2, %v4912_v2  ;;  %1930 = vmatprep.mubr.f32.mxu0 %v4855_v0 }
  0x3c   : > { %4748 = vmatmul.mubr.msk.f32.vlgmr.msra.gmra.mrb[20].mxu1 %vm190_vm3, %v4553_v23  ;;  %4560 = vmatprep.subr.msk.mxu0 %vm194_vm2, %v4928_v6 }
  0x3d   : > { %4750 = vmatprep.subr.mxu1 %v4855_v0  ;;  %4752 = vmatprep.mubr.msk.f32.mxu1 %vm4856_vm0, %v4855_v0 }
  0x3e   : > { %4556 = vmatmul.mubr.msk.f32.vlgmr.msra.gmra.mrb[20].mxu0 %vm190_vm3, %v4553_v23  ;;  %4751 = vmatpush3.msk.msra.mxu1 %vm194_vm2, %v4931_v7 }
  0x3f   : > { %4561 = vmatpush1.msk.msra.mxu0 %vm194_vm2, %v4918_v4  ;;  %2101 = vmatprep.mubr.f32.mxu0 %v4855_v0 }
  0x40   : > { %4753 = vmatmul.mubr.msk.f32.vlgmr.msra.gmra.mrb[22].mxu1 %vm190_vm3, %v4559_v24  ;;  %4566 = vmatprep.subr.msk.mxu0 %vm194_vm2, %v4924_v5 }
  0x41   : > { %4755 = vmatprep.subr.mxu1 %v4855_v0  ;;  %4757 = vmatprep.mubr.msk.f32.mxu1 %vm4856_vm0, %v4855_v0 }
  0x42   : > { %4562 = vmatmul.mubr.msk.f32.vlgmr.msra.gmra.mrb[22].mxu0 %vm190_vm3, %v4559_v24  ;;  %4756 = vmatpush3.msk.msra.mxu1 %vm194_vm2, %v4915_v3 }
  0x43   : > { %4567 = vmatpush1.msk.msra.mxu0 %vm194_vm2, %v4912_v2  ;;  %2270 = vmatprep.mubr.f32.mxu0 %v4855_v0 }
  0x44   : > { %4758 = vmatmul.mubr.msk.f32.vlgmr.msra.gmra.mrb[24].mxu1 %vm190_vm3, %v4565_v25  ;;  %4572 = vmatprep.subr.msk.mxu0 %vm194_vm2, %v4928_v6 }
  0x45   : > { %4760 = vmatprep.subr.mxu1 %v4855_v0  ;;  %4762 = vmatprep.mubr.msk.f32.mxu1 %vm4856_vm0, %v4855_v0 }
  0x46   : > { %4568 = vmatmul.mubr.msk.f32.vlgmr.msra.gmra.mrb[24].mxu0 %vm190_vm3, %v4565_v25  ;;  %4761 = vmatpush3.msk.msra.mxu1 %vm194_vm2, %v4931_v7 }
  0x47   : > { %4573 = vmatpush1.msk.msra.mxu0 %vm194_vm2, %v4918_v4  ;;  %2441 = vmatprep.mubr.f32.mxu0 %v4855_v0 }
  0x48   : > { %4763 = vmatmul.mubr.msk.f32.vlgmr.msra.gmra.mrb[26].mxu1 %vm190_vm3, %v4571_v26  ;;  %4578 = vmatprep.subr.msk.mxu0 %vm194_vm2, %v4924_v5 }
  0x49   : > { %4765 = vmatprep.subr.mxu1 %v4855_v0  ;;  %4767 = vmatprep.mubr.msk.f32.mxu1 %vm4856_vm0, %v4855_v0 }
  0x4a   : > { %4574 = vmatmul.mubr.msk.f32.vlgmr.msra.gmra.mrb[26].mxu0 %vm190_vm3, %v4571_v26  ;;  %4766 = vmatpush3.msk.msra.mxu1 %vm194_vm2, %v4915_v3 }
  0x4b   : > { %4579 = vmatpush1.msk.msra.mxu0 %vm194_vm2, %v4912_v2  ;;  %2610 = vmatprep.mubr.f32.mxu0 %v4855_v0 }
  0x4c   : > { %4768 = vmatmul.mubr.msk.f32.vlgmr.msra.gmra.mrb[28].mxu1 %vm190_vm3, %v4577_v27  ;;  %4584 = vmatprep.subr.msk.mxu0 %vm194_vm2, %v4990_v12 }
  0x4d   : > { %4770 = vmatprep.subr.mxu1 %v4855_v0  ;;  %4772 = vmatprep.mubr.msk.f32.mxu1 %vm4856_vm0, %v4855_v0 }
  0x4e   : > { %4580 = vmatmul.mubr.msk.f32.vlgmr.msra.gmra.mrb[28].mxu0 %vm190_vm3, %v4577_v27  ;;  %4771 = vmatpush3.msk.msra.mxu1 %vm194_vm2, %v5008_v15 }
  0x4f   : > { %4585 = vmatpush1.msk.msra.mxu0 %vm194_vm2, %v4974_v10  ;;  %2781 = vmatprep.mubr.f32.mxu0 %v4855_v0 }
  0x50   : > { %4773 = vmatmul.mubr.msk.f32.vlgmr.msra.gmra.mrb[30].mxu1 %vm190_vm3, %v4583_v28  ;;  %4590 = vmatprep.subr.msk.mxu0 %vm194_vm2, %v5015_v16 }
  0x51   : > { %4775 = vmatprep.subr.mxu1 %v4855_v0  ;;  %4777 = vmatprep.mubr.msk.f32.mxu1 %vm4856_vm0, %v4855_v0 }
  0x52   : > { %4586 = vmatmul.mubr.msk.f32.vlgmr.msra.gmra.mrb[30].mxu0 %vm190_vm3, %v4583_v28  ;;  %4776 = vmatpush3.msk.msra.mxu1 %vm194_vm2, %v5030_v18 }
  0x53   : > { %4591 = vmatpush1.msk.msra.mxu0 %vm194_vm2, %v4996_v13  ;;  %2950 = vmatprep.mubr.f32.mxu0 %v4855_v0 }
  0x54   : > { %4778 = vmatmul.mubr.msk.f32.vlgmr.msra.gmra.mrb[32].mxu1 %vm190_vm3, %v4589_v29  ;;  %4596 = vmatprep.subr.msk.mxu0 %vm194_vm2, %v4990_v12 }
  0x55   : > { %4780 = vmatprep.subr.mxu1 %v4855_v0  ;;  %4782 = vmatprep.mubr.msk.f32.mxu1 %vm4856_vm0, %v4855_v0 }
  0x56   : > { %4592 = vmatmul.mubr.msk.f32.vlgmr.msra.gmra.mrb[32].mxu0 %vm190_vm3, %v4589_v29  ;;  %4781 = vmatpush3.msk.msra.mxu1 %vm194_vm2, %v5008_v15 }
  0x57   : > { %4597 = vmatpush1.msk.msra.mxu0 %vm194_vm2, %v4974_v10  ;;  %3119 = vmatprep.mubr.f32.mxu0 %v4855_v0 }
  0x58   : > { %4783 = vmatmul.mubr.msk.f32.vlgmr.msra.gmra.mrb[34].mxu1 %vm190_vm3, %v4595_v30  ;;  %4602 = vmatprep.subr.msk.mxu0 %vm194_vm2, %v5015_v16 }
  0x59   : > { %4785 = vmatprep.subr.mxu1 %v4855_v0  ;;  %4787 = vmatprep.mubr.msk.f32.mxu1 %vm4856_vm0, %v4855_v0 }
  0x5a   : > { %4598 = vmatmul.mubr.msk.f32.vlgmr.msra.gmra.mrb[34].mxu0 %vm190_vm3, %v4595_v30  ;;  %4786 = vmatpush3.msk.msra.mxu1 %vm194_vm2, %v5030_v18 }
  0x5b   : > { %4603 = vmatpush1.msk.msra.mxu0 %vm194_vm2, %v4996_v13  ;;  %3288 = vmatprep.mubr.f32.mxu0 %v4855_v0 }
  0x5c   : > { %4788 = vmatmul.mubr.msk.f32.vlgmr.msra.gmra.mrb[36].mxu1 %vm190_vm3, %v4601_v31  ;;  %4608 = vmatprep.subr.msk.mxu0 %vm194_vm2, %v4990_v12 }
  0x5d   : > { %4790 = vmatprep.subr.mxu1 %v4855_v0  ;;  %4792 = vmatprep.mubr.msk.f32.mxu1 %vm4856_vm0, %v4855_v0 }
  0x5e   : > { %4604 = vmatmul.mubr.msk.f32.vlgmr.msra.gmra.mrb[36].mxu0 %vm190_vm3, %v4601_v31  ;;  %4791 = vmatpush3.msk.msra.mxu1 %vm194_vm2, %v5008_v15 }
  0x5f   : > { %4609 = vmatpush1.msk.msra.mxu0 %vm194_vm2, %v4974_v10  ;;  %3457 = vmatprep.mubr.f32.mxu0 %v4855_v0 }
  0x60   : > { %4793 = vmatmul.mubr.msk.f32.vlgmr.msra.gmra.mrb[38].mxu1 %vm190_vm3, %v4607_v32  ;;  %4614 = vmatprep.subr.msk.mxu0 %vm194_vm2, %v4924_v5 }
  0x61   : > { %4795 = vmatprep.subr.mxu1 %v4855_v0  ;;  %4797 = vmatprep.mubr.msk.f32.mxu1 %vm4856_vm0, %v4855_v0 }
  0x62   : > { %4610 = vmatmul.mubr.msk.f32.vlgmr.msra.gmra.mrb[38].mxu0 %vm190_vm3, %v4607_v32  ;;  %4796 = vmatpush3.msk.msra.mxu1 %vm194_vm2, %v4915_v3 }
  0x63   : > { %4615 = vmatpush1.msk.msra.mxu0 %vm194_vm2, %v4912_v2  ;;  %3626 = vmatprep.mubr.f32.mxu0 %v4855_v0 }
  0x64   : > { %4798 = vmatmul.mubr.msk.f32.vlgmr.msra.gmra.mrb[40].mxu1 %vm190_vm3, %v4613_v33  ;;  %4620 = vmatprep.subr.msk.mxu0 %vm194_vm2, %v4928_v6 }
  0x65   : > { %4800 = vmatprep.subr.mxu1 %v4855_v0  ;;  %4802 = vmatprep.mubr.msk.f32.mxu1 %vm4856_vm0, %v4855_v0 }
  0x66   : > { %4616 = vmatmul.mubr.msk.f32.vlgmr.msra.gmra.mrb[40].mxu0 %vm190_vm3, %v4613_v33  ;;  %4801 = vmatpush3.msk.msra.mxu1 %vm194_vm2, %v4931_v7 }
  0x67   : > { %4621 = vmatpush1.msk.msra.mxu0 %vm194_vm2, %v4918_v4  ;;  %3797 = vmatprep.mubr.f32.mxu0 %v4855_v0 }
  0x68   : > { %4803 = vmatmul.mubr.msk.f32.vlgmr.msra.gmra.mrb[42].mxu1 %vm190_vm3, %v4619_v34  ;;  %4626 = vmatprep.subr.msk.mxu0 %vm194_vm2, %v4924_v5 }
  0x69   : > { %4805 = vmatprep.subr.mxu1 %v4855_v0  ;;  %4807 = vmatprep.mubr.msk.f32.mxu1 %vm4856_vm0, %v4855_v0 }
  0x6a   : > { %4622 = vmatmul.mubr.msk.f32.vlgmr.msra.gmra.mrb[42].mxu0 %vm190_vm3, %v4619_v34  ;;  %4806 = vmatpush3.msk.msra.mxu1 %vm194_vm2, %v4915_v3 }
  0x6b   : > { %4627 = vmatpush1.msk.msra.mxu0 %vm194_vm2, %v4912_v2  ;;  %3966 = vmatprep.mubr.f32.mxu0 %v4855_v0 }
  0x6c   : > { %4808 = vmatmul.mubr.msk.f32.vlgmr.msra.gmra.mrb[44].mxu1 %vm190_vm3, %v4625_v35  ;;  %4632 = vmatprep.subr.msk.mxu0 %vm194_vm2, %v4928_v6 }
  0x6d   : > { %4810 = vmatprep.subr.mxu1 %v4855_v0  ;;  %4812 = vmatprep.mubr.msk.f32.mxu1 %vm4856_vm0, %v4855_v0 }
  0x6e   : > { %4628 = vmatmul.mubr.msk.f32.vlgmr.msra.gmra.mrb[44].mxu0 %vm190_vm3, %v4625_v35  ;;  %4811 = vmatpush3.msk.msra.mxu1 %vm194_vm2, %v4931_v7 }
  0x6f   : > { %4633 = vmatpush1.msk.msra.mxu0 %vm194_vm2, %v4918_v4  ;;  %4137 = vmatprep.mubr.f32.mxu0 %v4855_v0 }
  0x70   : > { %4813 = vmatmul.mubr.msk.f32.vlgmr.msra.gmra.mrb[46].mxu1 %vm190_vm3, %v4631_v36  ;;  %4638 = vmatprep.subr.msk.mxu0 %vm194_vm2, %v4924_v5 }
  0x71   : > { %4815 = vmatprep.subr.mxu1 %v4855_v0  ;;  %4817 = vmatprep.mubr.msk.f32.mxu1 %vm4856_vm0, %v4855_v0  ;;  %vm4395_vm0 = vcmask 867328  }
  0x72   : > { %4634 = vmatmul.mubr.msk.f32.vlgmr.msra.gmra.mrb[46].mxu0 %vm190_vm3, %v4631_v36  ;;  %4816 = vmatpush3.msk.msra.mxu1 %vm194_vm2, %v4915_v3 }
  0x73   : > { %4639 = vmatpush1.msk.msra.mxu0 %vm194_vm2, %v4912_v2  ;;  %4306 = vmatprep.mubr.f32.mxu0 %v4855_v0  ;;  %vm3726_vm2 = vcmask 195584  }
  0x74   : > { %4818 = vmatmul.mubr.msk.f32.vlgmr.msra.gmra.mrb[48].mxu1 %vm190_vm3, %v4637_v37 }
  0x76   : > { %4640 = vmatmul.mubr.msk.f32.vlgmr.msra.gmra.mrb[48].mxu0 %vm190_vm3, %v4637_v37  ;;  %vm4066_vm3 = vcmask 187392  }
  0xe6   : > { %v338_v39 = vpop.f32.mrb[0].mxu1 }
  0xe7   : > { %v347_v40 = vadd.f32 %v344_v38, %v338_v39  ;;  %v4699_v41 = vpop.f32.mrb[1].mxu1 }
  0xe9   : > { %350 = vst.msk [vmem:[#allocation2 + $0x10] sm:$0xff] %vm173_vm1, %v347_v40  ;;  %v267_v42 = vpop.f32.mrb[0].mxu0 }
  0xea   : > { %v269_v43 = vpop.f32.mrb[1].mxu0  ;;  %v502_v44 = vpop.f32.mrb[2].mxu1 }
  0xeb   : > { %v4704_v45 = vpop.f32.mrb[3].mxu1 }
  0xed   : > { %v431_v46 = vpop.f32.mrb[2].mxu0 }
  0xee   : > { %v5320_v47 = vadd.f32 %v431_v46, %v267_v42  ;;  %v433_v48 = vpop.f32.mrb[3].mxu0  ;;  %v657_v49 = vpop.f32.mrb[4].mxu1 }
  0xef   : > { %v5322_v50 = vadd.f32 %v433_v48, %v269_v43  ;;  %671 = vrot.lane.b32.xlu1 %v657_v49, %s4857_s18  ;;  %v4709_v51 = vpop.f32.mrb[5].mxu1 }
  0xf0   : > { %v508_v52 = vld [vmem:[#allocation2 + $0x10] sm:$0xff] }
  0xf1   : > { %v511_v53 = vadd.f32 %v508_v52, %v502_v44  ;;  %v586_v54 = vpop.f32.mrb[4].mxu0 }
  0xf2   : > { %667 = vrot.lane.b32.xlu0 %v586_v54, %s4857_s18  ;;  %v588_v56 = vpop.f32.mrb[5].mxu0 }
  0xf3   : > { %514 = vst.msk [vmem:[#allocation2 + $0x10] sm:$0xff] %vm173_vm1, %v511_v53  ;;  %v828_v57 = vpop.f32.mrb[6].mxu1 }
  0xf4   : > { %v4714_v58 = vpop.f32.mrb[7].mxu1 }
  0xf5   : > { %v757_v59 = vpop.f32.mrb[6].mxu0 }
  0xf6   : > { %669 = vrot.lane.b32.xlu0 %v588_v56, %s4857_s18  ;;  %838 = vrot.lane.b32.xlu1 %v757_v59, %s4857_s18  ;;  %v759_v60 = vpop.f32.mrb[7].mxu0 }
  0xf7   : > { %v997_v61 = vpop.f32.mrb[8].mxu1 }
  0xf8   : > { %v4719_v62 = vpop.f32.mrb[9].mxu1 }
  0xf9   : > { %v926_v63 = vpop.f32.mrb[8].mxu0 }
  0xfa   : > { %842 = vrot.lane.b32.xlu1 %v828_v57, %s4857_s18  ;;  %840 = vrot.lane.b32.xlu0 %v759_v60, %s4857_s18  ;;  %v928_v0 = vpop.f32.mrb[9].mxu0 }
  0xfb   : > { %v5331_v1 = vpop.f32.mrb[10].mxu1 }
  0xfc   : > { %v4724_v2 = vpop.f32.mrb[11].mxu1 }
  0xfd   : > { %v5333_v3 = vpop.f32.mrb[10].mxu0 }
  0xfe   : > { %1007 = vrot.lane.b32.xlu0 %v926_v63, %s4859_s19  ;;  %1009 = vrot.lane.b32.xlu1 %v928_v0, %s4859_s19  ;;  %v5337_v4 = vpop.f32.mrb[11].mxu0 }
  0xff   : > { %v5339_v5 = vpop.f32.mrb[12].mxu1 }
 0x100   : > { %v4729_v6 = vpop.f32.mrb[13].mxu1 }
 0x101   : > { %v5341_v7 = vpop.f32.mrb[12].mxu0 }
 0x102   : > { %1011 = vrot.lane.b32.xlu0 %v997_v61, %s4859_s19  ;;  %v5344_v8 = vpop.f32.mrb[13].mxu0 }
 0x103   : > { %v1496_v9 = vpop.f32.mrb[14].mxu1 }
 0x104   : > { %v4734_v10 = vpop.f32.mrb[15].mxu1 }
 0x105   : > { %v1425_v11 = vpop.f32.mrb[14].mxu0 }
 0x106   : > { %1506 = vrot.lane.b32.xlu1 %v1425_v11, %s4857_s18  ;;  %v1427_v12 = vpop.f32.mrb[15].mxu0 }
 0x107   : > { %1508 = vrot.lane.b32.xlu0 %v1427_v12, %s4857_s18  ;;  %v1665_v13 = vpop.f32.mrb[16].mxu1 }
 0x108   : > { %v4739_v14 = vpop.f32.mrb[17].mxu1 }
 0x109   : > { %v1594_v15 = vpop.f32.mrb[16].mxu0 }
 0x10a   : > { %1510 = vrot.lane.b32.xlu1 %v1496_v9, %s4857_s18  ;;  %v1596_v16 = vpop.f32.mrb[17].mxu0 }
 0x10b   : > { %1675 = vrot.lane.b32.xlu0 %v1594_v15, %s4857_s18  ;;  %v1834_v17 = vpop.f32.mrb[18].mxu1 }
 0x10c   : > { %v4744_v18 = vpop.f32.mrb[19].mxu1 }
 0x10d   : > { %v1763_v19 = vpop.f32.mrb[18].mxu0 }
 0x10e   : > { %1677 = vrot.lane.b32.xlu1 %v1596_v16, %s4857_s18  ;;  %v1765_v20 = vpop.f32.mrb[19].mxu0 }
 0x10f   : > { %1679 = vrot.lane.b32.xlu0 %v1665_v13, %s4857_s18  ;;  %v2003_v21 = vpop.f32.mrb[20].mxu1 }
 0x110   : > { %v4749_v22 = vpop.f32.mrb[21].mxu1 }
 0x111   : > { %v1932_v23 = vpop.f32.mrb[20].mxu0 }
 0x112   : > { %1844 = vrot.lane.b32.xlu1 %v1763_v19, %s4859_s19  ;;  %v1934_v24 = vpop.f32.mrb[21].mxu0 }
 0x113   : > { %1846 = vrot.lane.b32.xlu0 %v1765_v20, %s4859_s19  ;;  %v2174_v25 = vpop.f32.mrb[22].mxu1 }
 0x114   : > { %v4754_v26 = vpop.f32.mrb[23].mxu1 }
 0x115   : > { %v2103_v27 = vpop.f32.mrb[22].mxu0 }
 0x116   : > { %1848 = vrot.lane.b32.xlu1 %v1834_v17, %s4859_s19  ;;  %v2105_v28 = vpop.f32.mrb[23].mxu0 }
 0x117   : > { %2013 = vrot.lane.b32.xlu0 %v1932_v23, %s4860_s20  ;;  %v2343_v29 = vpop.f32.mrb[24].mxu1 }
 0x118   : > { %v4759_v30 = vpop.f32.mrb[25].mxu1 }
 0x119   : > { %v2272_v31 = vpop.f32.mrb[24].mxu0 }
 0x11a   : > { %2015 = vrot.lane.b32.xlu1 %v1934_v24, %s4860_s20  ;;  %v2274_v32 = vpop.f32.mrb[25].mxu0 }
 0x11b   : > { %2017 = vrot.lane.b32.xlu0 %v2003_v21, %s4860_s20  ;;  %v2514_v33 = vpop.f32.mrb[26].mxu1 }
 0x11c   : > { %v4764_v34 = vpop.f32.mrb[27].mxu1 }
 0x11d   : > { %v2443_v35 = vpop.f32.mrb[26].mxu0 }
 0x11e   : > { %2184 = vrot.lane.b32.xlu1 %v2103_v27, %s4860_s20  ;;  %v2445_v36 = vpop.f32.mrb[27].mxu0 }
 0x11f   : > { %2186 = vrot.lane.b32.xlu0 %v2105_v28, %s4860_s20  ;;  %v2683_v37 = vpop.f32.mrb[28].mxu1 }
 0x120   : > { %v4769_v38 = vpop.f32.mrb[29].mxu1 }
 0x121   : > { %v2612_v39 = vpop.f32.mrb[28].mxu0 }
 0x122   : > { %2188 = vrot.lane.b32.xlu1 %v2174_v25, %s4860_s20  ;;  %v2614_v40 = vpop.f32.mrb[29].mxu0  ;;  %v663_v25 = vld [vmem:[#allocation2 + $0x10] sm:$0xff] }
 0x123   : > { %2353 = vrot.lane.b32.xlu0 %v2272_v31, %s4861_s21  ;;  %v2854_v41 = vpop.f32.mrb[30].mxu1 }
 0x124   : > { %v4774_v42 = vpop.f32.mrb[31].mxu1 }
 0x125   : > { %v2783_v43 = vpop.f32.mrb[30].mxu0 }
 0x126   : > { %2355 = vrot.lane.b32.xlu1 %v2274_v32, %s4861_s21  ;;  %v2785_v44 = vpop.f32.mrb[31].mxu0 }
 0x127   : > { %2357 = vrot.lane.b32.xlu0 %v2343_v29, %s4861_s21  ;;  %v3023_v45 = vpop.f32.mrb[32].mxu1 }
 0x128   : > { %v4779_v46 = vpop.f32.mrb[33].mxu1 }
 0x129   : > { %v2952_v48 = vpop.f32.mrb[32].mxu0 }
 0x12a   : > { %2524 = vrot.lane.b32.xlu1 %v2443_v35, %s4861_s21  ;;  %v2954_v49 = vpop.f32.mrb[33].mxu0 }
 0x12b   : > { %2526 = vrot.lane.b32.xlu0 %v2445_v36, %s4861_s21  ;;  %v3192_v51 = vpop.f32.mrb[34].mxu1 }
 0x12c   : > { %v4784_v52 = vpop.f32.mrb[35].mxu1 }
 0x12d   : > { %v3121_v53 = vpop.f32.mrb[34].mxu0 }
 0x12e   : > { %2528 = vrot.lane.b32.xlu1 %v2514_v33, %s4861_s21  ;;  %v3123_v54 = vpop.f32.mrb[35].mxu0 }
 0x12f   : > { %2693 = vrot.lane.b32.xlu0 %v2612_v39, %s4862_s22  ;;  %v3361_v55 = vpop.f32.mrb[36].mxu1 }
 0x130   : > { %v4789_v56 = vpop.f32.mrb[37].mxu1 }
 0x131   : > { %v3290_v57 = vpop.f32.mrb[36].mxu0 }
 0x132   : > { %2695 = vrot.lane.b32.xlu1 %v2614_v40, %s4862_s22  ;;  %v3292_v58 = vpop.f32.mrb[37].mxu0 }
 0x133   : > { %2697 = vrot.lane.b32.xlu0 %v2683_v37, %s4862_s22  ;;  %v3530_v59 = vpop.f32.mrb[38].mxu1 }
 0x134   : > { %v4794_v60 = vpop.f32.mrb[39].mxu1 }
 0x135   : > { %v3459_v61 = vpop.f32.mrb[38].mxu0 }
 0x136   : > { %2864 = vrot.lane.b32.xlu1 %v2783_v43, %s4860_s20  ;;  %v3461_v62 = vpop.f32.mrb[39].mxu0 }
 0x137   : > { %2866 = vrot.lane.b32.xlu0 %v2785_v44, %s4860_s20  ;;  %v3699_v63 = vpop.f32.mrb[40].mxu1 }
 0x138   : > { %v4799_v0 = vpop.f32.mrb[41].mxu1 }
 0x139   : > { %v3628_v2 = vpop.f32.mrb[40].mxu0 }
 0x13a   : > { %2868 = vrot.lane.b32.xlu1 %v2854_v41, %s4860_s20  ;;  %v3630_v6 = vpop.f32.mrb[41].mxu0 }
 0x13b   : > { %3033 = vrot.lane.b32.xlu0 %v2952_v48, %s4860_s20  ;;  %v3870_v9 = vpop.f32.mrb[42].mxu1 }
 0x13c   : > { %v4804_v10 = vpop.f32.mrb[43].mxu1 }
 0x13d   : > { %v3799_v11 = vpop.f32.mrb[42].mxu0 }
 0x13e   : > { %3035 = vrot.lane.b32.xlu1 %v2954_v49, %s4860_s20  ;;  %v3801_v12 = vpop.f32.mrb[43].mxu0 }
 0x13f   : > { %3037 = vrot.lane.b32.xlu0 %v3023_v45, %s4860_s20  ;;  %v4039_v13 = vpop.f32.mrb[44].mxu1 }
 0x140   : > { %v4809_v14 = vpop.f32.mrb[45].mxu1 }
 0x141   : > { %v3968_v15 = vpop.f32.mrb[44].mxu0 }
 0x142   : > { %3202 = vrot.lane.b32.xlu1 %v3121_v53, %s4861_s21  ;;  %v3970_v16 = vpop.f32.mrb[45].mxu0 }
 0x143   : > { %3204 = vrot.lane.b32.xlu0 %v3123_v54, %s4861_s21  ;;  %v4210_v17 = vpop.f32.mrb[46].mxu1 }
 0x144   : > { %v4814_v18 = vpop.f32.mrb[47].mxu1 }
 0x145   : > { %v4139_v19 = vpop.f32.mrb[46].mxu0 }
 0x146   : > { %3206 = vrot.lane.b32.xlu1 %v3192_v51, %s4861_s21  ;;  %v4141_v20 = vpop.f32.mrb[47].mxu0 }
 0x147   : > { %3371 = vrot.lane.b32.xlu0 %v3290_v57, %s4861_s21  ;;  %v4379_v21 = vpop.f32.mrb[48].mxu1 }
 0x148   : > { %v4819_v22 = vpop.f32.mrb[49].mxu1 }
 0x149   : > { %v4308_v23 = vpop.f32.mrb[48].mxu0 }
 0x14a   : > { %3373 = vrot.lane.b32.xlu1 %v3292_v58, %s4861_s21  ;;  %v4310_v24 = vpop.f32.mrb[49].mxu0 }
 0x14b   : > { %3375 = vrot.lane.b32.xlu0 %v3361_v55, %s4861_s21 }
 0x14e   : > { %3540 = vrot.lane.b32.xlu1 %v3459_v61, %s4862_s22 }
 0x14f   : > { %3542 = vrot.lane.b32.xlu0 %v3461_v62, %s4862_s22 }
 0x152   : > { %3544 = vrot.lane.b32.xlu1 %v3530_v59, %s4862_s22 }
 0x153   : > { %3709 = vrot.lane.b32.xlu0 %v3628_v2, %s4863_s23 }
 0x156   : > { %3711 = vrot.lane.b32.xlu1 %v3630_v6, %s4863_s23 }
 0x157   : > { %3713 = vrot.lane.b32.xlu0 %v3699_v63, %s4863_s23 }
 0x15a   : > { %3880 = vrot.lane.b32.xlu1 %v3799_v11, %s4863_s23 }
 0x15b   : > { %3882 = vrot.lane.b32.xlu0 %v3801_v12, %s4863_s23 }
 0x15e   : > { %3884 = vrot.lane.b32.xlu1 %v3870_v9, %s4863_s23 }
 0x15f   : > { %4049 = vrot.lane.b32.xlu0 %v3968_v15, %s4864_s24 }
 0x161   : > { %v672_v26 = vpop.permute.xlu1 %671 }
 0x162   : > { %v681_v27 = vadd.f32 %v672_v26, %v663_v25  ;;  %4051 = vrot.lane.b32.xlu1 %v3970_v16, %s4864_s24 }
 0x163   : > { %4053 = vrot.lane.b32.xlu0 %v4039_v13, %s4864_s24 }
 0x164   : > { %685 = vst.msk [vmem:[#allocation2 + $0x10] sm:$0xff] %vm684_vm4, %v681_v27  ;;  %v668_v28 = vpop.permute.xlu0 %667 }
 0x166   : > { %4220 = vrot.lane.b32.xlu1 %v4139_v19, %s4864_s24 }
 0x167   : > { %4222 = vrot.lane.b32.xlu0 %v4141_v20, %s4864_s24 }
 0x168   : > { %v670_v29 = vpop.permute.xlu0 %669  ;;  %v839_v30 = vpop.permute.xlu1 %838 }
 0x169   : > { %v674_v31 = vsel %vm673_vm5, %v668_v28, %v670_v29  ;;  %v675_v32 = vsel %vm673_vm5, %v670_v29, %v672_v26 }
 0x16a   : > { %v679_v33 = vadd.f32 %v674_v31, %v5320_v47  ;;  %v680_v34 = vadd.f32 %v675_v32, %v5322_v50  ;;  %4224 = vrot.lane.b32.xlu1 %v4210_v17, %s4864_s24  ;;  %v4411_v47 = vld [vmem:[%s5509_s2] sm:$0xff] }
 0x16b   : > { %v834_v35 = vld [vmem:[#allocation2 + $0x10] sm:$0xff]  ;;  %4389 = vrot.lane.b32.xlu0 %v4308_v23, %s4865_s25 }
 0x16c   : > { %v843_v36 = vpop.permute.xlu1 %842  ;;  %v841_v37 = vpop.permute.xlu0 %840 }
 0x16d   : > { %v851_v38 = vadd.f32 %v843_v36, %v834_v35  ;;  %v844_v39 = vsel %vm673_vm5, %v839_v30, %v841_v37  ;;  %v845_v40 = vsel %vm673_vm5, %v841_v37, %v843_v36 }
 0x16e   : > { %v849_v41 = vadd.f32 %v844_v39, %v679_v33  ;;  %v850_v42 = vadd.f32 %v845_v40, %v680_v34  ;;  %4391 = vrot.lane.b32.xlu1 %v4310_v24, %s4865_s25 }
 0x16f   : > { %854 = vst.msk [vmem:[#allocation2 + $0x10] sm:$0xff] %vm684_vm4, %v851_v38  ;;  %4393 = vrot.lane.b32.xlu0 %v4379_v21, %s4865_s25 }
 0x170   : > { %v1008_v50 = vpop.permute.xlu0 %1007  ;;  %v1010_v43 = vpop.permute.xlu1 %1009 }
 0x171   : > { %v1014_v44 = vsel %vm1013_vm6, %v1008_v50, %v1010_v43 }
 0x172   : > { %v1019_v45 = vadd.f32 %v1014_v44, %v849_v41  ;;  %4414 = vperm.xlu1 %4841, %v4411_v47  }
 0x174   : > { %v1012_v46 = vpop.permute.xlu0 %1011  ;;  %v1184_v48 = vadd.f32 %v5333_v3, %v1019_v45 }
 0x175   : > { %v1015_v49 = vsel %vm1013_vm6, %v1010_v43, %v1012_v46 }
 0x176   : > { %v1003_v51 = vld [vmem:[#allocation2 + $0x10] sm:$0xff]  ;;  %v1020_v52 = vadd.f32 %v1015_v49, %v850_v42  ;;  %v1348_v53 = vadd.f32 %v5341_v7, %v1184_v48 }
 0x177   : > { %v1021_v54 = vadd.f32 %v1012_v46, %v1003_v51 }
 0x178   : > { %v1185_v55 = vadd.f32 %v5337_v4, %v1020_v52  ;;  %v1507_v56 = vpop.permute.xlu1 %1506 }
 0x179   : > { %1025 = vst.msk [vmem:[#allocation2 + $0x10] sm:$0xff] %vm1024_vm7, %v1021_v54  ;;  %v1509_v57 = vpop.permute.xlu0 %1508 }
 0x17a   : > { %v1349_v58 = vadd.f32 %v5344_v8, %v1185_v55  ;;  %v1512_v59 = vsel %vm673_vm5, %v1507_v56, %v1509_v57 }
 0x17b   : > { %v1517_v60 = vadd.f32 %v1512_v59, %v1348_v53 }
 0x17c   : > { %v1511_v3 = vpop.permute.xlu1 %1510 }
 0x17d   : > { %v1513_v61 = vsel %vm673_vm5, %v1509_v57, %v1511_v3  ;;  %v1676_v62 = vpop.permute.xlu0 %1675 }
 0x17e   : > { %v1518_v63 = vadd.f32 %v1513_v61, %v1349_v58 }
 0x180   : > { %v1183_v0 = vld [vmem:[#allocation2 + $0x10] sm:$0xff]  ;;  %v1678_v2 = vpop.permute.xlu1 %1677 }
 0x181   : > { %v1186_v7 = vadd.f32 %v1183_v0, %v5331_v1  ;;  %v1680_v6 = vpop.permute.xlu0 %1679  ;;  %v1681_v4 = vsel %vm673_vm5, %v1676_v62, %v1678_v2 }
 0x182   : > { %v1682_v9 = vsel %vm673_vm5, %v1678_v2, %v1680_v6  ;;  %v1686_v10 = vadd.f32 %v1681_v4, %v1517_v60 }
 0x183   : > { %1189 = vst.msk [vmem:[#allocation2 + $0x10] sm:$0xff] %vm173_vm1, %v1186_v7  ;;  %v1687_v8 = vadd.f32 %v1682_v9, %v1518_v63 }
 0x184   : > { %v1845_v11 = vpop.permute.xlu1 %1844 }
 0x185   : > { %v1847_v12 = vpop.permute.xlu0 %1846 }
 0x186   : > { %v1850_v52 = vsel %vm1013_vm6, %v1845_v11, %v1847_v12 }
 0x187   : > { %v1855_v56 = vadd.f32 %v1850_v52, %v1686_v10 }
 0x188   : > { %v1849_v13 = vpop.permute.xlu1 %1848 }
 0x189   : > { %v2014_v14 = vpop.permute.xlu0 %2013  ;;  %v1851_v54 = vsel %vm1013_vm6, %v1847_v12, %v1849_v13 }
 0x18a   : > { %v1347_v15 = vld [vmem:[#allocation2 + $0x10] sm:$0xff]  ;;  %v1856_v59 = vadd.f32 %v1851_v54, %v1687_v8 }
 0x18b   : > { %v1350_v16 = vadd.f32 %v1347_v15, %v5339_v5 }
 0x18c   : > { %v2016_v17 = vpop.permute.xlu1 %2015 }
 0x18d   : > { %1353 = vst.msk [vmem:[#allocation2 + $0x10] sm:$0xff] %vm173_vm1, %v1350_v16  ;;  %v2018_v1 = vpop.permute.xlu0 %2017  ;;  %v2020_v55 = vsel %vm2019_vm9, %v2014_v14, %v2016_v17 }
 0x18e   : > { %v2021_v57 = vsel %vm2019_vm9, %v2016_v17, %v2018_v1  ;;  %v2025_v61 = vadd.f32 %v2020_v55, %v1855_v56 }
 0x18f   : > { %v2026_v0 = vadd.f32 %v2021_v57, %v1856_v59 }
 0x190   : > { %v2185_v18 = vpop.permute.xlu1 %2184 }
 0x191   : > { %v2187_v19 = vpop.permute.xlu0 %2186 }
 0x192   : > { %v2190_v60 = vsel %vm2019_vm9, %v2185_v18, %v2187_v19 }
 0x194   : > { %v1502_v20 = vld [vmem:[#allocation2 + $0x10] sm:$0xff]  ;;  %v2189_v21 = vpop.permute.xlu1 %2188 }
 0x195   : > { %v1519_v22 = vadd.f32 %v1511_v3, %v1502_v20  ;;  %v2354_v23 = vpop.permute.xlu0 %2353  ;;  %v2191_v62 = vsel %vm2019_vm9, %v2187_v19, %v2189_v21 }
 0x196   : > { %v2196_v10 = vadd.f32 %v2191_v62, %v2026_v0 }
 0x197   : > { %1522 = vst.msk [vmem:[#allocation2 + $0x10] sm:$0xff] %vm684_vm4, %v1519_v22 }
 0x198   : > { %v2356_v24 = vpop.permute.xlu1 %2355 }
 0x199   : > { %v2358_v25 = vpop.permute.xlu0 %2357  ;;  %v2360_v7 = vsel %vm2359_vm10, %v2354_v23, %v2356_v24 }
 0x19a   : > { %v2361_v4 = vsel %vm2359_vm10, %v2356_v24, %v2358_v25 }
 0x19b   : > { %v2366_v14 = vadd.f32 %v2361_v4, %v2196_v10 }
 0x19c   : > { %v2525_v26 = vpop.permute.xlu1 %2524 }
 0x19d   : > { %v2527_v27 = vpop.permute.xlu0 %2526 }
 0x19e   : > { %v1671_v28 = vld [vmem:[#allocation2 + $0x10] sm:$0xff]  ;;  %v2530_v8 = vsel %vm2359_vm10, %v2525_v26, %v2527_v27 }
 0x19f   : > { %v1688_v29 = vadd.f32 %v1680_v6, %v1671_v28  ;;  %v2195_v6 = vadd.f32 %v2190_v60, %v2025_v61 }
 0x1a0   : > { %v5412_v30 = vpop.permute.xlu1 %2528 }
 0x1a1   : > { %1691 = vst.msk [vmem:[#allocation2 + $0x10] sm:$0xff] %vm684_vm4, %v1688_v29  ;;  %v2694_v5 = vpop.permute.xlu0 %2693  ;;  %v2365_v12 = vadd.f32 %v2360_v7, %v2195_v6  ;;  %vm4406_vm4 = vcmask 179200  }
 0x1a3   : > { %v2535_v16 = vadd.f32 %v2530_v8, %v2365_v12 }
 0x1a4   : > { %v2696_v31 = vpop.permute.xlu1 %2695 }
 0x1a5   : > { %v5415_v32 = vpop.permute.xlu0 %2697  ;;  %v2700_v15 = vsel %vm2699_vm12, %v2694_v5, %v2696_v31 }
 0x1a6   : > { %v2701_v17 = vsel %vm2699_vm12, %v2696_v31, %v5415_v32 }
 0x1a8   : > { %v1840_v33 = vld [vmem:[#allocation2 + $0x10] sm:$0xff]  ;;  %v2865_v34 = vpop.permute.xlu1 %2864 }
 0x1a9   : > { %v1857_v35 = vadd.f32 %v1849_v13, %v1840_v33  ;;  %v2867_v36 = vpop.permute.xlu0 %2866  ;;  %v2531_v13 = vsel %vm2359_vm10, %v2527_v27, %v5412_v30 }
 0x1aa   : > { %v2536_v18 = vadd.f32 %v2531_v13, %v2366_v14  ;;  %v2870_v19 = vsel %vm2019_vm9, %v2865_v34, %v2867_v36 }
 0x1ab   : > { %1860 = vst.msk [vmem:[#allocation2 + $0x10] sm:$0xff] %vm1024_vm7, %v1857_v35 }
 0x1ac   : > { %v5418_v37 = vpop.permute.xlu1 %2868  ;;  %v2706_v23 = vadd.f32 %v2701_v17, %v2536_v18 }
 0x1ad   : > { %v3034_v38 = vpop.permute.xlu0 %3033  ;;  %v2871_v22 = vsel %vm2019_vm9, %v2867_v36, %v5418_v37 }
 0x1ae   : > { %v2876_v5 = vadd.f32 %v2871_v22, %v2706_v23 }
 0x1b0   : > { %v3036_v39 = vpop.permute.xlu1 %3035 }
 0x1b1   : > { %v5420_v40 = vpop.permute.xlu0 %3037  ;;  %v3039_v24 = vsel %vm2019_vm9, %v3034_v38, %v3036_v39 }
 0x1b2   : > { %v2009_v41 = vld [vmem:[#allocation2 + $0x10] sm:$0xff]  ;;  %v3040_v27 = vsel %vm2019_vm9, %v3036_v39, %v5420_v40 }
 0x1b3   : > { %v2027_v42 = vadd.f32 %v2018_v1, %v2009_v41  ;;  %v3045_v36 = vadd.f32 %v3040_v27, %v2876_v5 }
 0x1b4   : > { %v3203_v47 = vpop.permute.xlu1 %3202 }
 0x1b5   : > { %2031 = vst.msk [vmem:[#allocation2 + $0x10] sm:$0xff] %vm2030_vm8, %v2027_v42  ;;  %v3205_v50 = vpop.permute.xlu0 %3204 }
 0x1b6   : > { %v3208_v31 = vsel %vm2359_vm10, %v3203_v47, %v3205_v50 }
 0x1b8   : > { %v5423_v43 = vpop.permute.xlu1 %3206 }
 0x1b9   : > { %v3372_v44 = vpop.permute.xlu0 %3371  ;;  %v3209_v35 = vsel %vm2359_vm10, %v3205_v50, %v5423_v43 }
 0x1bc   : > { %v2180_v45 = vld [vmem:[#allocation2 + $0x10] sm:$0xff]  ;;  %v3374_v46 = vpop.permute.xlu1 %3373 }
 0x1bd   : > { %v2197_v48 = vadd.f32 %v2189_v21, %v2180_v45  ;;  %v5425_v49 = vpop.permute.xlu0 %3375  ;;  %v2705_v21 = vadd.f32 %v2700_v15, %v2535_v16  ;;  %v3377_v38 = vsel %vm2359_vm10, %v3372_v44, %v3374_v46 }
 0x1be   : > { %v3378_v39 = vsel %vm2359_vm10, %v3374_v46, %v5425_v49 }
 0x1bf   : > { %2200 = vst.msk [vmem:[#allocation2 + $0x10] sm:$0xff] %vm2030_vm8, %v2197_v48  ;;  %v2875_v26 = vadd.f32 %v2870_v19, %v2705_v21 }
 0x1c0   : > { %v3541_v51 = vpop.permute.xlu1 %3540 }
 0x1c1   : > { %v3543_v53 = vpop.permute.xlu0 %3542  ;;  %v3044_v34 = vadd.f32 %v3039_v24, %v2875_v26 }
 0x1c2   : > { %v3546_v45 = vsel %vm2699_vm12, %v3541_v51, %v3543_v53 }
 0x1c3   : > { %v3213_v41 = vadd.f32 %v3208_v31, %v3044_v34 }
 0x1c4   : > { %v5432_v58 = vpop.permute.xlu1 %3544 }
 0x1c5   : > { %v3710_v3 = vpop.permute.xlu0 %3709  ;;  %v3382_v48 = vadd.f32 %v3377_v38, %v3213_v41  ;;  %v3547_v50 = vsel %vm2699_vm12, %v3543_v53, %v5432_v58 }
 0x1c6   : > { %v2349_v63 = vld [vmem:[#allocation2 + $0x10] sm:$0xff] }
 0x1c7   : > { %v2367_v2 = vadd.f32 %v2358_v25, %v2349_v63  ;;  %v3551_v55 = vadd.f32 %v3546_v45, %v3382_v48 }
 0x1c8   : > { %v3712_v9 = vpop.permute.xlu1 %3711 }
 0x1c9   : > { %2371 = vst.msk [vmem:[#allocation2 + $0x10] sm:$0xff] %vm2370_vm11, %v2367_v2  ;;  %v5440_v11 = vpop.permute.xlu0 %3713  ;;  %v3716_v54 = vsel %vm3715_vm13, %v3710_v3, %v3712_v9 }
 0x1ca   : > { %v3717_v44 = vsel %vm3715_vm13, %v3712_v9, %v5440_v11  ;;  %v3721_v60 = vadd.f32 %v3716_v54, %v3551_v55 }
 0x1cc   : > { %v3881_v1 = vpop.permute.xlu1 %3880 }
 0x1cd   : > { %v3883_v20 = vpop.permute.xlu0 %3882 }
 0x1ce   : > { %v3886_v57 = vsel %vm3715_vm13, %v3881_v1, %v3883_v20 }
 0x1cf   : > { %v3891_v63 = vadd.f32 %v3886_v57, %v3721_v60 }
 0x1d0   : > { %v2520_v25 = vld [vmem:[#allocation2 + $0x10] sm:$0xff]  ;;  %v5453_v28 = vpop.permute.xlu1 %3884 }
 0x1d1   : > { %v2537_v29 = vadd.f32 %v5412_v30, %v2520_v25  ;;  %v4050_v33 = vpop.permute.xlu0 %4049  ;;  %v3214_v30 = vadd.f32 %v3209_v35, %v3045_v36  ;;  %v3887_v61 = vsel %vm3715_vm13, %v3883_v20, %v5453_v28 }
 0x1d3   : > { %2540 = vst.msk [vmem:[#allocation2 + $0x10] sm:$0xff] %vm2370_vm11, %v2537_v29  ;;  %v3383_v52 = vadd.f32 %v3378_v39, %v3214_v30 }
 0x1d4   : > { %v4052_v42 = vpop.permute.xlu1 %4051 }
 0x1d5   : > { %v5464_v47 = vpop.permute.xlu0 %4053  ;;  %v3552_v56 = vadd.f32 %v3547_v50, %v3383_v52  ;;  %v4056_v3 = vsel %vm4055_vm14, %v4050_v33, %v4052_v42 }
 0x1d6   : > { %v4057_v0 = vsel %vm4055_vm14, %v4052_v42, %v5464_v47  ;;  %v4061_v9 = vadd.f32 %v4056_v3, %v3891_v63 }
 0x1d7   : > { %v3722_v62 = vadd.f32 %v3717_v44, %v3552_v56 }
 0x1d8   : > { %v4221_v46 = vpop.permute.xlu1 %4220 }
 0x1d9   : > { %v4223_v59 = vpop.permute.xlu0 %4222  ;;  %v3892_v7 = vadd.f32 %v3887_v61, %v3722_v62 }
 0x1da   : > { %v2689_v51 = vld [vmem:[#allocation2 + $0x10] sm:$0xff]  ;;  %v4226_v6 = vsel %vm4055_vm14, %v4221_v46, %v4223_v59 }
 0x1db   : > { %v2707_v53 = vadd.f32 %v5415_v32, %v2689_v51  ;;  %v4062_v32 = vadd.f32 %v4057_v0, %v3892_v7  ;;  %v4231_v8 = vadd.f32 %v4226_v6, %v4061_v9 }
 0x1dc   : > { %v4225_v2 = vpop.permute.xlu1 %4224 }
 0x1dd   : > { %2711 = vst.msk [vmem:[#allocation2 + $0x10] sm:$0xff] %vm2710_vm15, %v2707_v53  ;;  %v4390_v4 = vpop.permute.xlu0 %4389  ;;  %v4227_v10 = vsel %vm4055_vm14, %v4223_v59, %v4225_v2 }
 0x1de   : > { %v4232_v13 = vadd.f32 %v4227_v10, %v4062_v32 }
 0x1e0   : > { %v4392_v12 = vpop.permute.xlu1 %4391 }
 0x1e1   : > { %v4394_v14 = vpop.permute.xlu0 %4393  ;;  %v4396_v15 = vsel %vm4395_vm0, %v4390_v4, %v4392_v12 }
 0x1e2   : > { %v4397_v16 = vsel %vm4395_vm0, %v4392_v12, %v4394_v14  ;;  %v4401_v17 = vadd.f32 %v4396_v15, %v4231_v8 }
 0x1e3   : > { %v4402_v1 = vadd.f32 %v4397_v16, %v4232_v13 }
 0x1e4   : > { %v2860_v18 = vld [vmem:[#allocation2 + $0x10] sm:$0xff] }
 0x1e5   : > { %v2877_v19 = vadd.f32 %v5418_v37, %v2860_v18 }
 0x1e7   : > { %2880 = vst.msk [vmem:[#allocation2 + $0x10] sm:$0xff] %vm2030_vm8, %v2877_v19 }
 0x1ee   : > { %v3029_v20 = vld [vmem:[#allocation2 + $0x10] sm:$0xff] }
 0x1ef   : > { %v3046_v21 = vadd.f32 %v5420_v40, %v3029_v20 }
 0x1f1   : > { %3049 = vst.msk [vmem:[#allocation2 + $0x10] sm:$0xff] %vm2030_vm8, %v3046_v21  ;;  %v4415_v22 = vpop.permute.xlu1 %4414 }
 0x1f2   : > { %v4417_v23 = vadd.f32 %v4415_v22, %v4401_v17  ;;  %v4418_v24 = vadd.f32 %v4415_v22, %v4402_v1 }
 0x1f4   : > { %v4420_v25 = vmax.f32 %v4417_v23, 0.0  ;;  %v4421_v37 = vmax.f32 %v4418_v24, 0.0 }
 0x1f6   : > { %4423 = vst [vmem:[%s5489_s4] sm:$0xff] %v4420_v25  ;;  %4424 = vst [vmem:[%s5489_s4 + $0x8] sm:$0xff] %v4421_v37 }
 0x1f8   : > { %v3198_v26 = vld [vmem:[#allocation2 + $0x10] sm:$0xff] }
 0x1f9   : > { %v3215_v40 = vadd.f32 %v5423_v43, %v3198_v26 }
 0x1fb   : > { %3218 = vst.msk [vmem:[#allocation2 + $0x10] sm:$0xff] %vm2370_vm11, %v3215_v40 }
 0x202   : > { %v3367_v27 = vld [vmem:[#allocation2 + $0x10] sm:$0xff] }
 0x203   : > { %v3384_v29 = vadd.f32 %v5425_v49, %v3367_v27 }
 0x205   : > { %3387 = vst.msk [vmem:[#allocation2 + $0x10] sm:$0xff] %vm2370_vm11, %v3384_v29 }
 0x20c   : > { %v3536_v5 = vld [vmem:[#allocation2 + $0x10] sm:$0xff] }
 0x20d   : > { %v3553_v31 = vadd.f32 %v5432_v58, %v3536_v5 }
 0x20f   : > { %3556 = vst.msk [vmem:[#allocation2 + $0x10] sm:$0xff] %vm2710_vm15, %v3553_v31 }
 0x216   : > { %v3705_v33 = vld [vmem:[#allocation2 + $0x10] sm:$0xff] }
 0x217   : > { %v3723_v34 = vadd.f32 %v5440_v11, %v3705_v33 }
 0x219   : > { %3727 = vst.msk [vmem:[#allocation2 + $0x10] sm:$0xff] %vm3726_vm2, %v3723_v34 }
 0x220   : > { %v3876_v35 = vld [vmem:[#allocation2 + $0x10] sm:$0xff] }
 0x221   : > { %v3893_v43 = vadd.f32 %v5453_v28, %v3876_v35 }
 0x223   : > { %3896 = vst.msk [vmem:[#allocation2 + $0x10] sm:$0xff] %vm3726_vm2, %v3893_v43 }
 0x22a   : > { %v4045_v36 = vld [vmem:[#allocation2 + $0x10] sm:$0xff] }
 0x22b   : > { %v4063_v49 = vadd.f32 %v5464_v47, %v4045_v36 }
 0x22d   : > { %4067 = vst.msk [vmem:[#allocation2 + $0x10] sm:$0xff] %vm4066_vm3, %v4063_v49 }
 0x234   : > { %v4216_v38 = vld [vmem:[#allocation2 + $0x10] sm:$0xff] }
 0x235   : > { %v4233_v41 = vadd.f32 %v4225_v2, %v4216_v38 }
 0x237   : > { %4236 = vst.msk [vmem:[#allocation2 + $0x10] sm:$0xff] %vm4066_vm3, %v4233_v41 }
 0x23e   : > { %v4385_v58 = vld [vmem:[#allocation2 + $0x10] sm:$0xff] }
 0x23f   : > { %v4403_v39 = vadd.f32 %v4394_v14, %v4385_v58 }
 0x241   : > { %4407 = vst.msk [vmem:[#allocation2 + $0x10] sm:$0xff] %vm4406_vm4, %v4403_v39 }
 0x248   : > { %v4410_v42 = vld [vmem:[#allocation2 + $0x10] sm:$0xff] }
 0x249   : > { %v4419_v11 = vadd.f32 %v4415_v22, %v4410_v42 }
 0x24b   : > { %v4422_v30 = vmax.f32 %v4419_v11, 0.0 }
 0x24d   : > { %4425 = vst.msk [vmem:[%s5489_s4 + $0x10] sm:$0xff] %vm173_vm1, %v4422_v30 }
 0x24e PF: > { %s13_s12 = sadd.s32 1, %s4853_s12  }
 0x24f   : > { %p10_p4 = scmp.ge.s32.totalorder %s13_s12, 4  }
 0x251   :  { %12 = sbr.rel (!%p10_p4) target bundleno = 1 (0x1), region = 89 }

</bundles_post_ra>
